<compile_context>
chip_gen: v7x
topology: tpu7x:2x2x1
jax: 0.10.0
libtpu: 0.0.40
codegen_flags: <defaults>
</compile_context>

<pallas_src>
import jax
import jax.numpy as jnp
from jax.experimental import pallas as pl
from jax.experimental.pallas import tpu as pltpu

LEAKY_SLOPE = 0.2
BN_EPS = 1e-5


# ----------------------------- Pallas kernels ------------------------------ #
def _mm_bias_leaky_kernel(p_ref, w_ref, b_ref, o_ref):
    """One M-tile: (bf16 patches) @ (bf16 weights) + bias + LeakyReLU."""
    y = jnp.dot(p_ref[...], w_ref[...], preferred_element_type=jnp.float32)
    y = y + b_ref[...]
    y = jnp.where(y >= 0.0, y, LEAKY_SLOPE * y)
    o_ref[...] = y.astype(o_ref.dtype)


def _mm_bias_bn_leaky_kernel(p_ref, w_ref, b_ref, g_ref, bt_ref, o_ref):
    """Whole layer in one tile: matmul + bias + train-mode BN + LeakyReLU."""
    y = jnp.dot(p_ref[...], w_ref[...], preferred_element_type=jnp.float32)
    y = y + b_ref[...]
    mean = jnp.mean(y, axis=0, keepdims=True)
    cent = y - mean
    var = jnp.mean(cent * cent, axis=0, keepdims=True)        # centered (stable)
    yhat = cent * jax.lax.rsqrt(var + BN_EPS) * g_ref[...] + bt_ref[...]
    o_ref[...] = jnp.where(yhat >= 0.0, yhat, LEAKY_SLOPE * yhat).astype(o_ref.dtype)


def _mm_bias_bn_leaky_head_kernel(p_ref, w_ref, b_ref, g_ref, bt_ref,
                                  w5_ref, gsel_ref, b5_ref, o_ref):
    """conv4 + BN + LeakyReLU fused with conv5 (4x4 valid conv == per-sample
    weighted reduction) + sigmoid.  Output: [N, 1] probabilities."""
    y = jnp.dot(p_ref[...], w_ref[...], preferred_element_type=jnp.float32)
    y = y + b_ref[...]
    mean = jnp.mean(y, axis=0, keepdims=True)
    cent = y - mean
    var = jnp.mean(cent * cent, axis=0, keepdims=True)
    yhat = cent * jax.lax.rsqrt(var + BN_EPS) * g_ref[...] + bt_ref[...]
    act = jnp.where(yhat >= 0.0, yhat, LEAKY_SLOPE * yhat)     # [M, C] f32
    # conv5: logits[n] = sum_{m in sample n} sum_c act[m, c] * w5[m, c] + b5
    z = jnp.dot(gsel_ref[...], act * w5_ref[...],
                preferred_element_type=jnp.float32)            # [N, C]
    logits = jnp.sum(z, axis=1, keepdims=True) + b5_ref[...]   # [N, 1]
    o_ref[...] = 1.0 / (1.0 + jnp.exp(-logits))                # sigmoid


# ------------------------------- JAX glue ---------------------------------- #
def _pad_cin(x_nhwc, w, mult=8):
    """Zero-pad input channels (and the matching weight Cin) to a multiple of
    `mult` so the im2col K dimension is lane-friendly."""
    cin = x_nhwc.shape[-1]
    pad = (-cin) % mult
    if pad:
        x_nhwc = jnp.pad(x_nhwc, ((0, 0), (0, 0), (0, 0), (0, pad)))
        w = jnp.pad(w, ((0, 0), (0, pad), (0, 0), (0, 0)))
    return x_nhwc, w


def _im2col_nhwc(x, kh, kw, stride, pad):
    """x: [N, H, W, C] (bf16) -> patches [N*OH*OW, KH*KW*C], K ordered (kh,kw,c)."""
    N, H, W, C = x.shape
    xp = jnp.pad(x, ((0, 0), (pad, pad), (pad, pad), (0, 0)))
    Hp, Wp = H + 2 * pad, W + 2 * pad
    oh = (Hp - kh) // stride + 1
    ow = (Wp - kw) // stride + 1
    cols = []
    for i in range(kh):
        for j in range(kw):
            cols.append(xp[:, i:i + stride * (oh - 1) + 1:stride,
                              j:j + stride * (ow - 1) + 1:stride, :])
    patches = jnp.stack(cols, axis=3)                  # [N, oh, ow, kh*kw, C]
    return patches.reshape(N * oh * ow, kh * kw * C), oh, ow


def _prep_weights(w, b):
    """w: [Cout, Cin, KH, KW] (PyTorch) -> ([K, Cout] bf16, [1, Cout] f32)."""
    Cout, Cin, KH, KW = w.shape
    wmat = jnp.transpose(w, (2, 3, 1, 0)).reshape(KH * KW * Cin, Cout)
    return wmat.astype(jnp.bfloat16), b.astype(jnp.float32).reshape(1, Cout)


def _pick_tm(M, K, Cout, budget_bytes=4 * 1024 * 1024):
    """Largest M-tile (divisor of M, multiple of 8) fitting a VMEM budget."""
    bytes_per_row = 2 * K + 2 * Cout + 4 * Cout        # bf16 patch + bf16 out + slack
    cap = max(8, budget_bytes // (2 * bytes_per_row))  # 2x: double buffering
    for tm in (1024, 512, 256, 128, 64, 32, 16, 8):
        if tm <= cap and M % tm == 0:
            return tm
    assert M % 8 == 0, "M must be a multiple of 8"
    return 8


def conv_leaky(x_nhwc, w, b, *, stride, pad):
    """Conv + bias + LeakyReLU (no BN), M-tiled with a parallel grid axis."""
    x_nhwc, w = _pad_cin(x_nhwc, w)
    Cout = w.shape[0]
    KH, KW = w.shape[2], w.shape[3]
    N = x_nhwc.shape[0]
    patches, oh, ow = _im2col_nhwc(x_nhwc, KH, KW, stride, pad)   # bf16
    M, K = patches.shape
    assert M % 8 == 0, "M must be a multiple of 8"
    wmat, bvec = _prep_weights(w, b)

    TM = _pick_tm(M, K, Cout)
    nt = M // TM
    y = pl.pallas_call(
        _mm_bias_leaky_kernel,
        grid=(nt,),
        in_specs=[pl.BlockSpec((TM, K), lambda i: (i, 0)),
                  pl.BlockSpec((K, Cout), lambda i: (0, 0)),
                  pl.BlockSpec((1, Cout), lambda i: (0, 0))],
        out_specs=pl.BlockSpec((TM, Cout), lambda i: (i, 0)),
        out_shape=jax.ShapeDtypeStruct((M, Cout), jnp.bfloat16),
        compiler_params=pltpu.CompilerParams(dimension_semantics=("parallel",)),
    )(patches, wmat, bvec)
    return y.reshape(N, oh, ow, Cout)


def conv_bn_leaky(x_nhwc, w, b, gamma, beta, *, stride, pad):
    """Conv + bias + batch-stat BN + LeakyReLU, fully fused in one pallas_call."""
    x_nhwc, w = _pad_cin(x_nhwc, w)
    Cout = w.shape[0]
    KH, KW = w.shape[2], w.shape[3]
    N = x_nhwc.shape[0]
    patches, oh, ow = _im2col_nhwc(x_nhwc, KH, KW, stride, pad)
    M, K = patches.shape
    assert M % 8 == 0, "M must be a multiple of 8"
    # Single-tile fused BN requires the whole M slab in VMEM.
    # TODO(synk): for large batches, tile M with a two-pass BN reduction.
    assert M * K * 2 <= 8 * 1024 * 1024, "BN layer too large for single tile"
    wmat, bvec = _prep_weights(w, b)
    gvec = gamma.astype(jnp.float32).reshape(1, Cout)
    btvec = beta.astype(jnp.float32).reshape(1, Cout)

    y = pl.pallas_call(
        _mm_bias_bn_leaky_kernel,
        grid=(1,),
        in_specs=[pl.BlockSpec((M, K), lambda i: (0, 0)),
                  pl.BlockSpec((K, Cout), lambda i: (0, 0)),
                  pl.BlockSpec((1, Cout), lambda i: (0, 0)),
                  pl.BlockSpec((1, Cout), lambda i: (0, 0)),
                  pl.BlockSpec((1, Cout), lambda i: (0, 0))],
        out_specs=pl.BlockSpec((M, Cout), lambda i: (0, 0)),
        out_shape=jax.ShapeDtypeStruct((M, Cout), jnp.bfloat16),
        compiler_params=pltpu.CompilerParams(dimension_semantics=("arbitrary",)),
    )(patches, wmat, bvec, gvec, btvec)
    return y.reshape(N, oh, ow, Cout)


def conv_bn_leaky_head(x_nhwc, w, b, gamma, beta, w5, b5, *, stride, pad):
    """conv4 + BN + LeakyReLU + conv5(+sigmoid) fused in one pallas_call.
    Returns probabilities of shape [N, 1]."""
    x_nhwc, w = _pad_cin(x_nhwc, w)
    Cout = w.shape[0]
    KH, KW = w.shape[2], w.shape[3]
    N = x_nhwc.shape[0]
    patches, oh, ow = _im2col_nhwc(x_nhwc, KH, KW, stride, pad)
    M, K = patches.shape
    assert M % 8 == 0, "M must be a multiple of 8"
    assert M * K * 2 <= 8 * 1024 * 1024, "BN layer too large for single tile"
    # conv5 (4x4, stride 1, valid) must reduce the conv4 map to 1x1.
    assert w5.shape == (1, Cout, oh, ow), (w5.shape, oh, ow)
    wmat, bvec = _prep_weights(w, b)
    gvec = gamma.astype(jnp.float32).reshape(1, Cout)
    btvec = beta.astype(jnp.float32).reshape(1, Cout)

    sp = oh * ow
    # conv5 weight per (output-row, channel): rows of conv4 output are (n, oh, ow).
    w5_rows = jnp.transpose(w5, (0, 2, 3, 1)).reshape(sp, Cout).astype(jnp.float32)
    w5t = jnp.tile(w5_rows, (N, 1))                                   # [M, Cout]
    gsel = (jnp.arange(M)[None, :] // sp
            == jnp.arange(N)[:, None]).astype(jnp.float32)            # [N, M]
    b5v = b5.astype(jnp.float32).reshape(1, 1)

    probs = pl.pallas_call(
        _mm_bias_bn_leaky_head_kernel,
        grid=(1,),
        in_specs=[pl.BlockSpec((M, K), lambda i: (0, 0)),
                  pl.BlockSpec((K, Cout), lambda i: (0, 0)),
                  pl.BlockSpec((1, Cout), lambda i: (0, 0)),
                  pl.BlockSpec((1, Cout), lambda i: (0, 0)),
                  pl.BlockSpec((1, Cout), lambda i: (0, 0)),
                  pl.BlockSpec((M, Cout), lambda i: (0, 0)),
                  pl.BlockSpec((N, M), lambda i: (0, 0)),
                  pl.BlockSpec((1, 1), lambda i: (0, 0))],
        out_specs=pl.BlockSpec((N, 1), lambda i: (0, 0)),
        out_shape=jax.ShapeDtypeStruct((N, 1), jnp.float32),
        compiler_params=pltpu.CompilerParams(dimension_semantics=("arbitrary",)),
    )(patches, wmat, bvec, gvec, btvec, w5t, gsel, b5v)
    return probs


def _fused_conv1_weights(w1, b1, w2, b2):
    """Block-diagonal fusion of conv1_1 (image) and conv1_2 (label) + concat."""
    dh, c1, kh, kw = w1.shape
    c2 = w2.shape[1]
    w = jnp.zeros((2 * dh, c1 + c2, kh, kw), jnp.float32)
    w = w.at[:dh, :c1].set(w1)
    w = w.at[dh:, c1:].set(w2)
    return w, jnp.concatenate([b1, b2])


def init_params(key, d=16, cdim=2, std=0.02):
    """Deterministic synthetic weights mirroring discriminator.__init__ shapes."""
    def normal(k, shape):
        return std * jax.random.normal(k, shape, jnp.float32)

    ks = jax.random.split(key, 6)
    p = {}
    p["conv1_1_w"] = normal(ks[0], (d // 2, 3, 4, 4));    p["conv1_1_b"] = jnp.zeros((d // 2,), jnp.float32)
    p["conv1_2_w"] = normal(ks[1], (d // 2, cdim, 4, 4)); p["conv1_2_b"] = jnp.zeros((d // 2,), jnp.float32)
    p["conv2_w"]   = normal(ks[2], (d * 2, d, 4, 4));     p["conv2_b"]   = jnp.zeros((d * 2,), jnp.float32)
    p["conv2_bn_g"] = jnp.ones((d * 2,), jnp.float32);    p["conv2_bn_b"] = jnp.zeros((d * 2,), jnp.float32)
    p["conv3_w"]   = normal(ks[3], (d * 4, d * 2, 4, 4)); p["conv3_b"]   = jnp.zeros((d * 4,), jnp.float32)
    p["conv3_bn_g"] = jnp.ones((d * 4,), jnp.float32);    p["conv3_bn_b"] = jnp.zeros((d * 4,), jnp.float32)
    p["conv4_w"]   = normal(ks[4], (d * 8, d * 4, 4, 4)); p["conv4_b"]   = jnp.zeros((d * 8,), jnp.float32)
    p["conv4_bn_g"] = jnp.ones((d * 8,), jnp.float32);    p["conv4_bn_b"] = jnp.zeros((d * 8,), jnp.float32)
    p["conv5_w"]   = normal(ks[5], (1, d * 8, 4, 4));     p["conv5_b"]   = jnp.zeros((1,), jnp.float32)
    return p


def discriminator_forward(params, image, label):
    """Pallas implementation of discriminator.forward(input, label). NCHW in/out."""
    N = image.shape[0]
    # Single NCHW->NHWC transpose + concat + bf16 cast at the top.
    x = jnp.concatenate([jnp.transpose(image, (0, 2, 3, 1)),
                         jnp.transpose(label, (0, 2, 3, 1))],
                        axis=-1).astype(jnp.bfloat16)                 # [N,H,W,5]

    w1, b1 = _fused_conv1_weights(params["conv1_1_w"], params["conv1_1_b"],
                                  params["conv1_2_w"], params["conv1_2_b"])
    x = conv_leaky(x, w1, b1, stride=2, pad=1)                        # [N,32,32,16]
    x = conv_bn_leaky(x, params["conv2_w"], params["conv2_b"],
                      params["conv2_bn_g"], params["conv2_bn_b"],
                      stride=2, pad=1)                                # [N,16,16,32]
    x = conv_bn_leaky(x, params["conv3_w"], params["conv3_b"],
                      params["conv3_bn_g"], params["conv3_bn_b"],
                      stride=2, pad=1)                                # [N,8,8,64]
    probs = conv_bn_leaky_head(x, params["conv4_w"], params["conv4_b"],
                               params["conv4_bn_g"], params["conv4_bn_b"],
                               params["conv5_w"], params["conv5_b"],
                               stride=2, pad=1)                       # [N,1]
    return probs.reshape(N, 1, 1, 1)


# Pure-JAX f32 reference (matches the PyTorch module, train-mode BN).
def _ref_forward(params, image, label):
    def conv(x, w, b, stride, pad):
        y = jax.lax.conv_general_dilated(
            x, w, window_strides=(stride, stride),
            padding=[(pad, pad), (pad, pad)],
            dimension_numbers=("NCHW", "OIHW", "NCHW"))
        return y + b.reshape(1, -1, 1, 1)

    def bn(x, g, bt):
        mean = jnp.mean(x, axis=(0, 2, 3), keepdims=True)
        var = jnp.mean((x - mean) ** 2, axis=(0, 2, 3), keepdims=True)
        return ((x - mean) * jax.lax.rsqrt(var + BN_EPS)
                * g.reshape(1, -1, 1, 1) + bt.reshape(1, -1, 1, 1))

    leaky = lambda v: jnp.where(v >= 0, v, LEAKY_SLOPE * v)
    x = leaky(conv(image, params["conv1_1_w"], params["conv1_1_b"], 2, 1))
    y = leaky(conv(label, params["conv1_2_w"], params["conv1_2_b"], 2, 1))
    x = jnp.concatenate([x, y], axis=1)
    x = leaky(bn(conv(x, params["conv2_w"], params["conv2_b"], 2, 1),
                 params["conv2_bn_g"], params["conv2_bn_b"]))
    x = leaky(bn(conv(x, params["conv3_w"], params["conv3_b"], 2, 1),
                 params["conv3_bn_g"], params["conv3_bn_b"]))
    x = leaky(bn(conv(x, params["conv4_w"], params["conv4_b"], 2, 1),
                 params["conv4_bn_g"], params["conv4_bn_b"]))
    return jax.nn.sigmoid(conv(x, params["conv5_w"], params["conv5_b"], 1, 0))


if __name__ == "__main__":
    # DCGAN discriminator needs 64x64 spatial input so conv5 (4x4, stride 1,
    # no pad) yields a 1x1 map. Small config: d=16, cdim=2, batch=2.
    key = jax.random.PRNGKey(0)
    kp, ki, kl = jax.random.split(key, 3)

    d, cdim, batch = 16, 2, 2
    params = init_params(kp, d=d, cdim=cdim)
    image = jax.random.normal(ki, (batch, 3, 64, 64), jnp.float32)
    label = jax.random.normal(kl, (batch, cdim, 64, 64), jnp.float32)

    out = jax.block_until_ready(discriminator_forward(params, image, label))
    assert out.shape == (batch, 1, 1, 1), out.shape
    assert bool(jnp.all(jnp.isfinite(out)))
    assert bool(jnp.all((out >= 0.0) & (out <= 1.0)))  # sigmoid output range

    ref = jax.block_until_ready(_ref_forward(params, image, label))
    assert bool(jnp.all(jnp.abs(out - ref) < 3e-2)), (out, ref)  # bf16 matmul tol

    print("KERNEL_OK")
</pallas_src>

<mosaic_0001>
module attributes {stable_mosaic.version = 11 : i64} {
  func.func @_mm_bias_leaky_kernel(%arg0: i32, %arg1: memref<1024x128xbf16, #tpu.memory_space<vmem>>, %arg2: memref<128x16xbf16, #tpu.memory_space<vmem>>, %arg3: memref<1x16xf32, #tpu.memory_space<vmem>>, %arg4: memref<1024x16xbf16, #tpu.memory_space<vmem>>) attributes {dimension_semantics = [#tpu.dimension_semantics<parallel>], iteration_bounds = array<i64: 2>, scalar_prefetch = 0 : i64, scratch_operands = 0 : i64, tpu.core_type = #tpu.core_type<tc>, window_params = [{transform_indices = @transform_0, window_bounds = array<i64: 1024, 128>}, {pipeline_mode = #tpu.pipeline_mode<synchronous>, transform_indices = @transform_1, window_bounds = array<i64: 128, 16>}, {pipeline_mode = #tpu.pipeline_mode<synchronous>, transform_indices = @transform_2, window_bounds = array<i64: 1, 16>}, {transform_indices = @transform_3, window_bounds = array<i64: 1024, 16>}]} {
    %c0 = arith.constant 0 : index
    %c0_0 = arith.constant 0 : index
    %0 = vector.load %arg1[%c0, %c0_0] : memref<1024x128xbf16, #tpu.memory_space<vmem>>, vector<1024x128xbf16>
    %c0_1 = arith.constant 0 : index
    %c0_2 = arith.constant 0 : index
    %1 = vector.load %arg2[%c0_1, %c0_2] : memref<128x16xbf16, #tpu.memory_space<vmem>>, vector<128x16xbf16>
    %cst = arith.constant dense<0.000000e+00> : vector<1024x16xf32>
    %2 = tpu.matmul %0, %1, %cst {dimension_numbers = #tpu.dot_dimension_numbers<[1], [0], [0], [1], [0, 0, 1, 1], [], []>} : vector<1024x128xbf16>, vector<128x16xbf16>, vector<1024x16xf32> -> vector<1024x16xf32>
    %c0_3 = arith.constant 0 : index
    %c0_4 = arith.constant 0 : index
    %3 = vector.load %arg3[%c0_3, %c0_4] : memref<1x16xf32, #tpu.memory_space<vmem>>, vector<1x16xf32>
    %4 = vector.broadcast %3 : vector<1x16xf32> to vector<1024x16xf32>
    %5 = arith.addf %2, %4 : vector<1024x16xf32>
    %cst_5 = arith.constant 0.000000e+00 : f32
    %6 = vector.broadcast %cst_5 : f32 to vector<1024x16xf32>
    %7 = arith.cmpf oge, %5, %6 : vector<1024x16xf32>
    %cst_6 = arith.constant 2.000000e-01 : f32
    %8 = vector.broadcast %cst_6 : f32 to vector<1024x16xf32>
    %9 = arith.mulf %8, %5 : vector<1024x16xf32>
    %10 = arith.select %7, %5, %9 : vector<1024x16xi1>, vector<1024x16xf32>
    %11 = arith.truncf %10 : vector<1024x16xf32> to vector<1024x16xbf16>
    %c0_7 = arith.constant 0 : index
    %c0_8 = arith.constant 0 : index
    %12 = vector.load %arg4[%c0_7, %c0_8] : memref<1024x16xbf16, #tpu.memory_space<vmem>>, vector<1024x16xbf16>
    tpu.vector_store %arg4[%c0_7, %c0_8], %11 {strides = array<i32>} : memref<1024x16xbf16, #tpu.memory_space<vmem>>, vector<1024x16xbf16>,
    return
  }
  func.func @transform_0(%arg0: i32) -> (i32, i32) {
    %c0_i32 = arith.constant 0 : i32
    %c0_i32_0 = arith.constant 0 : i32
    return %arg0, %c0_i32 : i32, i32
  }
  func.func @transform_1(%arg0: i32) -> (i32, i32) {
    %c0_i32 = arith.constant 0 : i32
    %c0_i32_0 = arith.constant 0 : i32
    %c0_i32_1 = arith.constant 0 : i32
    return %c0_i32, %c0_i32_0 : i32, i32
  }
  func.func @transform_2(%arg0: i32) -> (i32, i32) {
    %c0_i32 = arith.constant 0 : i32
    %c0_i32_0 = arith.constant 0 : i32
    %c0_i32_1 = arith.constant 0 : i32
    return %c0_i32, %c0_i32_0 : i32, i32
  }
  func.func @transform_3(%arg0: i32) -> (i32, i32) {
    %c0_i32 = arith.constant 0 : i32
    %c0_i32_0 = arith.constant 0 : i32
    return %arg0, %c0_i32 : i32, i32
  }
}

</mosaic_0001>

<bundles_post_ra>
// kernel: tpu_custom_call.1
= control target key start
LH: loop header
LB: loop body
LE: loop exit
PB: predicated region body
PF: predicated region fallthrough
CT: control target
= control target key end

     0   :  { %8 = vsyncpa [#allocation3], 0  ;;  %s4060_s0 = inlined_call_operand.hbm [shape: bf16[2048,128], index: 0, kind: input, shape index: {}]   ;;  %s4061_s1 = inlined_call_operand.vmem [shape: bf16[128,16], index: 1, kind: input, shape index: {}]   ;;  %s4062_s2 = inlined_call_operand.vmem [shape: f32[1,16], index: 2, kind: input, shape index: {}]   ;;  %s4063_s3 = inlined_call_operand.vmem [shape: bf16[2048,16], index: 3, kind: output, shape index: {}]  }
   0x1   :  { %10 = vsyncpa [#allocation3 + $0x1], 0  ;;  %s3192_s12 = smov 0   ;;  %s3194_s13 = smov 0  }
   0x2   :  { %s3196_s14 = smov 0   ;;  %s3198_s15 = smov 0  }
   0x3 LB: > { %s2414_s16 = sadd.s32 4294967295, %s3167_s15   ;;  %s3212_s17 = sadd.s32 1, %s3167_s15   ;;  %s3167_s15 = sphi %s3198_s15, %s4070_s15   ;;  %s3163_s14 = sphi %s3196_s14, %s4069_s14   ;;  %s3159_s13 = sphi %s3194_s13, %s4068_s13   ;;  %s3155_s12 = sphi %s3192_s12, %s4067_s12  }
   0x4   : > { %s20_s18 = ssub.s32 %s3167_s15, %s3212_s17  ;;  %s23_s19 = sadd.s32 1, %s3163_s14 }
   0x5   : > { %p21_p0 = scmp.eq.s32.totalorder %s20_s18, 0  ;;  %p30_p1 = scmp.ne.s32.totalorder %s3163_s14, %s3159_s13 }
   0x6   : > { %p31_p2 = scmp.eq.s32.totalorder %s3167_s15, 0  ;;  %p36_p3 = scmp.ne.s32.totalorder %s3159_s13, %s3155_s12 }
   0x7   : > { %s3222_s20 = scalar_select %p21_p0, %s3163_s14, %s23_s19  }
   0x8   : > { %p32_p4 = por %p31_p2, %p30_p1  ;;  %p37_p5 = scmp.eq.s32.totalorder %s2414_s16, 0 }
   0x9   : > { %p2995_p6 = scmp.lt.s32.totalorder %s3167_s15, 2  ;;  %s134_s22 = sand.u32 1, %s3163_s14  }
   0xa   : > { %p3227_p7 = por %p37_p5, %p36_p3  ;;  %s2418_s23 = sshll.u32 %s134_s22, 9 }
   0xb   : > { %s2628_s24 = sshll.u32 %s3167_s15, 13  ;;  %s138_s28 = scalar_lea.vmem [#allocation2], %s2418_s23 }
   0xc   : > { %s3236_s27 = scalar_lea.hbm %s4060_s0, %s2628_s24  ;;  %s145_s29 = sshll.u32 %s138_s28, 4  ;;  %s3238_s29 = int_to_ptr.vmem [resolvable:$true] %s145_s29 }
   0xd   : > { %p3240_p8 = pnand %p2995_p6, %p32_p4  ;;  %s3245_s4 = scalar_lea.sflag [#allocation3], %s134_s22 }
   0xe   : > { %s3103_s5 = scalar_lea.hbm %s3236_s27, 8192  ;;  %s3108_s8 = scalar_lea.hbm %s4060_s0, 16384 }
   0xf   : > { %p3104_p10 = scmp.ne.s32.totalorder %s3236_s27, %s3103_s5  ;;  %p3105_p11 = pneg %p3240_p8 }
  0x10   : > { %p3109_p0 = scmp.lt.u32.totalorder %s3236_s27, %s4060_s0  ;;  %p3110_p1 = scmp.lt.u32.totalorder %s3108_s8, %s3103_s5 }
  0x11   : > { %p3106_p12 = pnand %p3105_p11, %p3104_p10  ;;  %p3112_p3 = scmp.lt.u32.totalorder %s3103_s5, %s3236_s27 }
  0x12   : > { %p3111_p2 = por %p3110_p1, %p3109_p0 }
  0x13   : > { %p3107_p13 = pneg %p3106_p12 }
  0x14   : > { %p3113_p4 = por %p3112_p3, %p3111_p2 }
  0x16   : > { %p3114_p5 = pnand %p3113_p4, %p3107_p13 }
  0x18   : > { %3117 = shalt.err (!%p3114_p5)
}
  0x19   : > { %s3118_s11 = scalar_lea.vmem %s3238_s29, 8192  ;;  %s3169_s12 = smov [#allocation2]  }
  0x1a   : > { %p3119_p6 = scmp.ne.s32.totalorder %s3238_s29, %s3118_s11  ;;  %s3123_s18 = sshll.u32 %s3169_s12, 4  ;;  %s3124_s18 = int_to_ptr.vmem [resolvable:$false] %s3123_s18 }
  0x1b   : > { %s3125_s19 = scalar_lea.vmem %s3124_s18, 16384  ;;  %p3126_p9 = scmp.lt.s32.totalorder %s3238_s29, %s3124_s18 }
  0x1c   : > { %p3121_p10 = pnand %p3119_p6, %p3105_p11  ;;  %p3127_p0 = scmp.lt.s32.totalorder %s3125_s19, %s3118_s11 }
  0x1e   : > { %p3122_p12 = pneg %p3121_p10  ;;  %p3128_p1 = por %p3127_p0, %p3126_p9 }
  0x20   : > { %p3129_p2 = pnand %p3128_p1, %p3122_p12 }
  0x22   : > { %3132 = shalt.err (!%p3129_p2)
}
  0x23   : > { %s3170_s22 = smov 64   ;;  %s3171_s23 = smov 4  }
  0x24   : > { %2994 = dma.hbm_to_vmem [thread:$0]  (!%p3240_p8), %s3236_s27, 8192, %s3238_s29, %s3245_s4, %s3170_s22, %s3170_s22, %s3171_s23  }
  0x25   : > { %p153_p11 = scmp.lt.s32.totalorder %s3167_s15, 3  ;;  %p4066_p13 = scmp.ge.s32.totalorder %s3167_s15, 1 }
  0x27   : > { %p154_p3 = pnand %p4066_p13, %p153_p11 }
  0x28   : > { %s159_s24 = sand.u32 (!%p154_p3), 1, %s3159_s13  }
  0x29   : > { %157 = sbr.rel (%p154_p3) target bundleno = 460 (0x1cc), region = 32  ;;  %s2422_s25 = sshll.u32 (!%p154_p3), %s159_s24, 9 }
  0x2a   : > { %s160_s26 = scalar_lea.sflag (!%p154_p3), [#allocation3], %s159_s24  ;;  %s3277_s28 = scalar_lea.vmem (!%p154_p3), [#allocation2], %s2422_s25 }
  0x30   : > { %3150 = dma.done.wait (%p3227_p7), %s160_s26, 8192  }
  0x31   : > { %3152 = vsyncadd (%p3227_p7), %s160_s26, 4294959104  ;;  %v3030_v0 = vld [vmem:[%s4061_s1] sm:$0xff]   ;;  %v3031_v1 = vld [vmem:[%s4061_s1 + $0x8] sm:$0xff]   ;;  %s2423_s23 = sshll.u32 %s2414_s16, 7  ;;  %vm2218_vm0 = vcmask 125952  }
  0x32   : > { %2829 = vmatprep.subr.bf16.mxu0 %v3030_v0  ;;  %2973 = vmatprep.subr.bf16.mxu1 %v3030_v0  ;;  %v3032_v2 = vld [vmem:[%s4061_s1 + $0x10] sm:$0xff]   ;;  %v3033_v3 = vld [vmem:[%s4061_s1 + $0x18] sm:$0xff]   ;;  %v3038_v4 = vld [vmem:[%s3277_s28] sm:$0xff]   ;;  %p188_p7 = scmp.lt.s32.totalorder %s2423_s23, 255 }
  0x33   : > { %2830 = vmatpush3.bf16.msra.mxu0 %v3030_v0  ;;  %2981 = vmatpush3.bf16.msra.mxu1 %v3030_v0  ;;  %v3039_v5 = vld [vmem:[%s3277_s28 + $0x100] sm:$0xff]   ;;  %v3035_v7 = vld [vmem:[%s4061_s1 + $0x28] sm:$0xff]   ;;  %v3036_v8 = vld [vmem:[%s4061_s1 + $0x30] sm:$0xff]  }
  0x34   : > { %2831 = vmatprep.subr.bf16.mxu0 %v3031_v1  ;;  %2974 = vmatprep.subr.bf16.mxu1 %v3031_v1  ;;  %v3034_v6 = vld [vmem:[%s4061_s1 + $0x20] sm:$0xff]   ;;  %v3037_v9 = vld [vmem:[%s4061_s1 + $0x38] sm:$0xff]   ;;  %v3040_v10 = vld [vmem:[%s3277_s28 + $0x8] sm:$0xff]   ;;  %s4072_s23 = smov (!%p188_p7, %s2423_s23), 255 }
  0x35   : > { %2845 = vmatprep.mubr.bf16.mxu0 %v3038_v4  ;;  %2909 = vmatprep.mubr.bf16.mxu1 %v3039_v5  ;;  %v3041_v11 = vld [vmem:[%s3277_s28 + $0x108] sm:$0xff]   ;;  %v3042_v12 = vld [vmem:[%s3277_s28 + $0x10] sm:$0xff]   ;;  %v3044_v14 = vld [vmem:[%s3277_s28 + $0x18] sm:$0xff]   ;;  %s2424_s26 = sshll.u32 %s4072_s23, 2 }
  0x36   : > { %v3043_v13 = vld [vmem:[%s3277_s28 + $0x110] sm:$0xff]   ;;  %v3045_v15 = vld [vmem:[%s3277_s28 + $0x118] sm:$0xff]   ;;  %v3046_v16 = vld [vmem:[%s3277_s28 + $0x20] sm:$0xff]  }
  0x37   : > { %2832 = vmatpush3.bf16.msra.mxu0 %v3031_v1  ;;  %2982 = vmatpush3.bf16.msra.mxu1 %v3031_v1  ;;  %v3047_v17 = vld [vmem:[%s3277_s28 + $0x120] sm:$0xff]   ;;  %v3048_v18 = vld [vmem:[%s3277_s28 + $0x28] sm:$0xff]   ;;  %v3050_v20 = vld [vmem:[%s3277_s28 + $0x30] sm:$0xff]  }
  0x38   : > { %2833 = vmatprep.subr.bf16.mxu0 %v3032_v2  ;;  %2975 = vmatprep.subr.bf16.mxu1 %v3032_v2  ;;  %v3049_v19 = vld [vmem:[%s3277_s28 + $0x128] sm:$0xff]   ;;  %v3051_v21 = vld [vmem:[%s3277_s28 + $0x130] sm:$0xff]   ;;  %v3052_v22 = vld [vmem:[%s3277_s28 + $0x38] sm:$0xff]  }
  0x39   : > { %v3053_v23 = vld [vmem:[%s3277_s28 + $0x138] sm:$0xff]   ;;  %v3054_v24 = vld [vmem:[%s3277_s28 + $0x40] sm:$0xff]   ;;  %v3056_v26 = vld [vmem:[%s3277_s28 + $0x48] sm:$0xff]  }
  0x3a   : > { %v3055_v25 = vld [vmem:[%s3277_s28 + $0x140] sm:$0xff]   ;;  %v3057_v27 = vld [vmem:[%s3277_s28 + $0x148] sm:$0xff]   ;;  %v3058_v28 = vld [vmem:[%s3277_s28 + $0x50] sm:$0xff]  }
  0x3b   : > { %2834 = vmatpush3.bf16.msra.mxu0 %v3032_v2  ;;  %2983 = vmatpush3.bf16.msra.mxu1 %v3032_v2  ;;  %v3059_v29 = vld [vmem:[%s3277_s28 + $0x150] sm:$0xff]   ;;  %v3060_v30 = vld [vmem:[%s3277_s28 + $0x58] sm:$0xff]   ;;  %v3062_v32 = vld [vmem:[%s3277_s28 + $0x60] sm:$0xff]  }
  0x3c   : > { %2835 = vmatprep.subr.bf16.mxu0 %v3033_v3  ;;  %2976 = vmatprep.subr.bf16.mxu1 %v3033_v3  ;;  %v3061_v31 = vld [vmem:[%s3277_s28 + $0x158] sm:$0xff]   ;;  %v3063_v33 = vld [vmem:[%s3277_s28 + $0x160] sm:$0xff]   ;;  %v3064_v34 = vld [vmem:[%s3277_s28 + $0x68] sm:$0xff]  }
  0x3d   : > { %v3065_v35 = vld [vmem:[%s3277_s28 + $0x168] sm:$0xff]   ;;  %v3066_v36 = vld [vmem:[%s3277_s28 + $0x70] sm:$0xff]   ;;  %v3068_v38 = vld [vmem:[%s3277_s28 + $0x78] sm:$0xff]  }
  0x3e   : > { %v3067_v37 = vld [vmem:[%s3277_s28 + $0x170] sm:$0xff]   ;;  %v3069_v39 = vld [vmem:[%s3277_s28 + $0x178] sm:$0xff]   ;;  %v3070_v40 = vld [vmem:[%s3277_s28 + $0x80] sm:$0xff]  }
  0x3f   : > { %2836 = vmatpush3.bf16.msra.mxu0 %v3033_v3  ;;  %2984 = vmatpush3.bf16.msra.mxu1 %v3033_v3  ;;  %v3071_v41 = vld [vmem:[%s3277_s28 + $0x180] sm:$0xff]   ;;  %v3072_v42 = vld [vmem:[%s3277_s28 + $0x88] sm:$0xff]   ;;  %v3074_v44 = vld [vmem:[%s3277_s28 + $0x90] sm:$0xff]  }
  0x40   : > { %2837 = vmatprep.subr.bf16.mxu0 %v3034_v6  ;;  %2977 = vmatprep.subr.bf16.mxu1 %v3034_v6  ;;  %v3073_v43 = vld [vmem:[%s3277_s28 + $0x188] sm:$0xff]   ;;  %v3075_v45 = vld [vmem:[%s3277_s28 + $0x190] sm:$0xff]   ;;  %v3076_v46 = vld [vmem:[%s3277_s28 + $0x98] sm:$0xff]  }
  0x41   : > { %v3077_v47 = vld [vmem:[%s3277_s28 + $0x198] sm:$0xff]   ;;  %v3078_v48 = vld [vmem:[%s3277_s28 + $0xa0] sm:$0xff]   ;;  %v3080_v50 = vld [vmem:[%s3277_s28 + $0xa8] sm:$0xff]  }
  0x42   : > { %v3079_v49 = vld [vmem:[%s3277_s28 + $0x1a0] sm:$0xff]   ;;  %v3081_v51 = vld [vmem:[%s3277_s28 + $0x1a8] sm:$0xff]   ;;  %v3082_v52 = vld [vmem:[%s3277_s28 + $0xb0] sm:$0xff]  }
  0x43   : > { %2838 = vmatpush3.bf16.msra.mxu0 %v3034_v6  ;;  %2985 = vmatpush3.bf16.msra.mxu1 %v3034_v6  ;;  %v3083_v53 = vld [vmem:[%s3277_s28 + $0x1b0] sm:$0xff]   ;;  %v3084_v54 = vld [vmem:[%s3277_s28 + $0xb8] sm:$0xff]   ;;  %v3086_v56 = vld [vmem:[%s3277_s28 + $0xc0] sm:$0xff]  }
  0x44   : > { %2839 = vmatprep.subr.bf16.mxu0 %v3035_v7  ;;  %2978 = vmatprep.subr.bf16.mxu1 %v3035_v7  ;;  %v3085_v55 = vld [vmem:[%s3277_s28 + $0x1b8] sm:$0xff]   ;;  %v3087_v57 = vld [vmem:[%s3277_s28 + $0x1c0] sm:$0xff]   ;;  %v3088_v58 = vld [vmem:[%s3277_s28 + $0xc8] sm:$0xff]  }
  0x45   : > { %v3089_v59 = vld [vmem:[%s3277_s28 + $0x1c8] sm:$0xff]   ;;  %v3090_v60 = vld [vmem:[%s3277_s28 + $0xd0] sm:$0xff]   ;;  %v3092_v62 = vld [vmem:[%s3277_s28 + $0xd8] sm:$0xff]  }
  0x46   : > { %v3091_v61 = vld [vmem:[%s3277_s28 + $0x1d0] sm:$0xff]   ;;  %v3093_v63 = vld [vmem:[%s3277_s28 + $0x1d8] sm:$0xff]   ;;  %v3094_v0 = vld [vmem:[%s3277_s28 + $0xe0] sm:$0xff]  }
  0x47   : > { %2840 = vmatpush3.bf16.msra.mxu0 %v3035_v7  ;;  %2986 = vmatpush3.bf16.msra.mxu1 %v3035_v7  ;;  %v3095_v1 = vld [vmem:[%s3277_s28 + $0x1e0] sm:$0xff]   ;;  %v3096_v2 = vld [vmem:[%s3277_s28 + $0xe8] sm:$0xff]   ;;  %v3098_v4 = vld [vmem:[%s3277_s28 + $0xf0] sm:$0xff]  }
  0x48   : > { %2841 = vmatprep.subr.bf16.mxu0 %v3036_v8  ;;  %2979 = vmatprep.subr.bf16.mxu1 %v3036_v8  ;;  %v3097_v3 = vld [vmem:[%s3277_s28 + $0x1e8] sm:$0xff]   ;;  %v3099_v5 = vld [vmem:[%s3277_s28 + $0x1f0] sm:$0xff]   ;;  %v3100_v6 = vld [vmem:[%s3277_s28 + $0xf8] sm:$0xff]  }
  0x49   : > { %v3101_v7 = vld [vmem:[%s3277_s28 + $0x1f8] sm:$0xff]   ;;  %s3385_s28 = scalar_lea.vmem %s4063_s3, %s2424_s26 }
  0x4b   : > { %2842 = vmatpush3.bf16.msra.mxu0 %v3036_v8  ;;  %2987 = vmatpush3.bf16.msra.mxu1 %v3036_v8  ;;  %v3376_v8 = vld [vmem:[%s4062_s2] ss:$0 sm:$0xff] }
  0x4c   : > { %2843 = vmatprep.subr.bf16.mxu0 %v3037_v9  ;;  %2980 = vmatprep.subr.bf16.mxu1 %v3037_v9 }
  0x4f   : > { %2844 = vmatpush3.bf16.msra.mxu0 %v3037_v9  ;;  %2988 = vmatpush3.bf16.msra.mxu1 %v3037_v9 }
  0x52   : > { %2846 = vmatmul.mubr.bf16.vlgmr.msra.gmra.mrb[0].mxu0 %v3040_v10  ;;  %2910 = vmatmul.mubr.bf16.vlgmr.msra.gmra.mrb[0].mxu1 %v3041_v11 }
  0x53   : > { %2849 = vmatprep.mubr.bf16.mxu0 %v3042_v12  ;;  %2913 = vmatprep.mubr.bf16.mxu1 %v3043_v13 }
  0x5a   : > { %2850 = vmatmul.mubr.bf16.gmra.mrb[4].mxu0 %v3044_v14  ;;  %2914 = vmatmul.mubr.bf16.gmra.mrb[4].mxu1 %v3045_v15 }
  0x5b   : > { %2853 = vmatprep.mubr.bf16.mxu0 %v3046_v16  ;;  %2917 = vmatprep.mubr.bf16.mxu1 %v3047_v17 }
  0x62   : > { %2854 = vmatmul.mubr.bf16.gmra.mrb[8].mxu0 %v3048_v18  ;;  %2918 = vmatmul.mubr.bf16.gmra.mrb[8].mxu1 %v3049_v19 }
  0x63   : > { %2857 = vmatprep.mubr.bf16.mxu0 %v3050_v20  ;;  %2921 = vmatprep.mubr.bf16.mxu1 %v3051_v21 }
  0x6a   : > { %2858 = vmatmul.mubr.bf16.gmra.mrb[12].mxu0 %v3052_v22  ;;  %2922 = vmatmul.mubr.bf16.gmra.mrb[12].mxu1 %v3053_v23 }
  0x6b   : > { %2861 = vmatprep.mubr.bf16.mxu0 %v3054_v24  ;;  %2925 = vmatprep.mubr.bf16.mxu1 %v3055_v25 }
  0x72   : > { %2862 = vmatmul.mubr.bf16.gmra.mrb[16].mxu0 %v3056_v26  ;;  %2926 = vmatmul.mubr.bf16.gmra.mrb[16].mxu1 %v3057_v27 }
  0x73   : > { %2865 = vmatprep.mubr.bf16.mxu0 %v3058_v28  ;;  %2929 = vmatprep.mubr.bf16.mxu1 %v3059_v29 }
  0x7a   : > { %2866 = vmatmul.mubr.bf16.gmra.mrb[20].mxu0 %v3060_v30  ;;  %2930 = vmatmul.mubr.bf16.gmra.mrb[20].mxu1 %v3061_v31 }
  0x7b   : > { %2869 = vmatprep.mubr.bf16.mxu0 %v3062_v32  ;;  %2933 = vmatprep.mubr.bf16.mxu1 %v3063_v33 }
  0x82   : > { %2870 = vmatmul.mubr.bf16.gmra.mrb[24].mxu0 %v3064_v34  ;;  %2934 = vmatmul.mubr.bf16.gmra.mrb[24].mxu1 %v3065_v35 }
  0x83   : > { %2873 = vmatprep.mubr.bf16.mxu0 %v3066_v36  ;;  %2937 = vmatprep.mubr.bf16.mxu1 %v3067_v37 }
  0x8a   : > { %2874 = vmatmul.mubr.bf16.gmra.mrb[28].mxu0 %v3068_v38  ;;  %2938 = vmatmul.mubr.bf16.gmra.mrb[28].mxu1 %v3069_v39 }
  0x8b   : > { %2877 = vmatprep.mubr.bf16.mxu0 %v3070_v40  ;;  %2941 = vmatprep.mubr.bf16.mxu1 %v3071_v41 }
  0x92   : > { %2878 = vmatmul.mubr.bf16.gmra.mrb[32].mxu0 %v3072_v42  ;;  %2942 = vmatmul.mubr.bf16.gmra.mrb[32].mxu1 %v3073_v43 }
  0x93   : > { %2881 = vmatprep.mubr.bf16.mxu0 %v3074_v44  ;;  %2945 = vmatprep.mubr.bf16.mxu1 %v3075_v45 }
  0x9a   : > { %2882 = vmatmul.mubr.bf16.gmra.mrb[36].mxu0 %v3076_v46  ;;  %2946 = vmatmul.mubr.bf16.gmra.mrb[36].mxu1 %v3077_v47 }
  0x9b   : > { %2885 = vmatprep.mubr.bf16.mxu0 %v3078_v48  ;;  %2949 = vmatprep.mubr.bf16.mxu1 %v3079_v49 }
  0xa2   : > { %2886 = vmatmul.mubr.bf16.gmra.mrb[40].mxu0 %v3080_v50  ;;  %2950 = vmatmul.mubr.bf16.gmra.mrb[40].mxu1 %v3081_v51 }
  0xa3   : > { %2889 = vmatprep.mubr.bf16.mxu0 %v3082_v52  ;;  %2953 = vmatprep.mubr.bf16.mxu1 %v3083_v53 }
  0xaa   : > { %2890 = vmatmul.mubr.bf16.gmra.mrb[44].mxu0 %v3084_v54  ;;  %2954 = vmatmul.mubr.bf16.gmra.mrb[44].mxu1 %v3085_v55 }
  0xab   : > { %2893 = vmatprep.mubr.bf16.mxu0 %v3086_v56  ;;  %2957 = vmatprep.mubr.bf16.mxu1 %v3087_v57 }
  0xb2   : > { %2894 = vmatmul.mubr.bf16.gmra.mrb[48].mxu0 %v3088_v58  ;;  %2958 = vmatmul.mubr.bf16.gmra.mrb[48].mxu1 %v3089_v59 }
  0xb3   : > { %2897 = vmatprep.mubr.bf16.mxu0 %v3090_v60  ;;  %2961 = vmatprep.mubr.bf16.mxu1 %v3091_v61 }
  0xba   : > { %2898 = vmatmul.mubr.bf16.gmra.mrb[52].mxu0 %v3092_v62  ;;  %2962 = vmatmul.mubr.bf16.gmra.mrb[52].mxu1 %v3093_v63 }
  0xbb   : > { %2901 = vmatprep.mubr.bf16.mxu0 %v3094_v0  ;;  %2965 = vmatprep.mubr.bf16.mxu1 %v3095_v1 }
  0xc2   : > { %2902 = vmatmul.mubr.bf16.gmra.mrb[56].mxu0 %v3096_v2  ;;  %2966 = vmatmul.mubr.bf16.gmra.mrb[56].mxu1 %v3097_v3 }
  0xc3   : > { %2905 = vmatprep.mubr.bf16.mxu0 %v3098_v4  ;;  %2969 = vmatprep.mubr.bf16.mxu1 %v3099_v5 }
  0xca   : > { %2906 = vmatmul.mubr.bf16.gmra.mrb[60].mxu0 %v3100_v6  ;;  %2970 = vmatmul.mubr.bf16.gmra.mrb[60].mxu1 %v3101_v7 }
 0x125   : > { %v2847_v9 = vpop.f32.mrb[0].mxu0  ;;  %v2911_v10 = vpop.f32.mrb[0].mxu1 }
 0x126   : > { %v820_v11 = vadd.f32 %v2847_v9, %v3376_v8  ;;  %v1076_v12 = vadd.f32 %v2911_v10, %v3376_v8  ;;  %v811_v13 = vpop.f32.mrb[1].mxu0  ;;  %v1067_v14 = vpop.f32.mrb[1].mxu1 }
 0x127   : > { %v812_v15 = vadd.f32 %v3376_v8, %v811_v13  ;;  %v1068_v16 = vadd.f32 %v3376_v8, %v1067_v14  ;;  %v2848_v17 = vpop.f32.mrb[2].mxu0  ;;  %v2912_v18 = vpop.f32.mrb[2].mxu1 }
 0x128   : > { %vm1324_vm1 = vcmp.ge.f32.partialorder %v820_v11, 0.0  ;;  %v1452_v19 = vmul.f32 0.2, %v820_v11  ;;  %vm1388_vm2 = vcmp.ge.f32.partialorder %v1076_v12, 0.0  ;;  %v1516_v20 = vmul.f32 0.2, %v1076_v12 }
 0x129   : > { %vm1322_vm3 = vcmp.ge.f32.partialorder %v812_v15, 0.0  ;;  %v1450_v21 = vmul.f32 0.2, %v812_v15  ;;  %vm1386_vm4 = vcmp.ge.f32.partialorder %v1068_v16, 0.0  ;;  %v1514_v22 = vmul.f32 0.2, %v1068_v16 }
 0x12a   : > { %v1580_v23 = vsel %vm1324_vm1, %v820_v11, %v1452_v19  ;;  %v1644_v24 = vsel %vm1388_vm2, %v1076_v12, %v1516_v20  ;;  %v823_v25 = vadd.f32 %v2848_v17, %v3376_v8  ;;  %v1079_v26 = vadd.f32 %v2912_v18, %v3376_v8  ;;  %v814_v27 = vpop.f32.mrb[3].mxu0  ;;  %v1070_v28 = vpop.f32.mrb[3].mxu1 }
 0x12b   : > { %v2631_v29 = vpack.c.bf16 %v1580_v23, %v1580_v23  ;;  %v2695_v30 = vpack.c.bf16 %v1644_v24, %v1644_v24  ;;  %v1578_v31 = vsel %vm1322_vm3, %v812_v15, %v1450_v21  ;;  %v1642_v32 = vsel %vm1386_vm4, %v1068_v16, %v1514_v22 }
 0x12c   : > { %v2629_v33 = vpack.c.bf16 %v1578_v31, %v1578_v31  ;;  %v2693_v34 = vpack.c.bf16 %v1642_v32, %v1642_v32  ;;  %vm1325_vm5 = vcmp.ge.f32.partialorder %v823_v25, 0.0  ;;  %v1453_v35 = vmul.f32 0.2, %v823_v25 }
 0x12d   : > { %2221 = vst.msk [vmem:[%s3385_s28 + $0x8] sm:$0xf] %vm2218_vm0, %v2631_v29  ;;  %2285 = vst.msk [vmem:[%s3385_s28 + $0x108] sm:$0xf] %vm2218_vm0, %v2695_v30  ;;  %vm1389_vm6 = vcmp.ge.f32.partialorder %v1079_v26, 0.0  ;;  %v815_v37 = vadd.f32 %v3376_v8, %v814_v27  ;;  %v1071_v38 = vadd.f32 %v3376_v8, %v1070_v28  ;;  %v2851_v39 = vpop.f32.mrb[4].mxu0 }
 0x12e   : > { %v1517_v36 = vmul.f32 0.2, %v1079_v26  ;;  %v2915_v40 = vpop.f32.mrb[4].mxu1  ;;  %2219 = vst.msk [vmem:[%s3385_s28] sm:$0xf] %vm2218_vm0, %v2629_v33  ;;  %v1581_v41 = vsel %vm1325_vm5, %v823_v25, %v1453_v35  ;;  %v836_v42 = vadd.f32 %v2851_v39, %v3376_v8  ;;  %v827_v44 = vpop.f32.mrb[5].mxu0 }
 0x12f   : > { %2283 = vst.msk [vmem:[%s3385_s28 + $0x100] sm:$0xf] %vm2218_vm0, %v2693_v34  ;;  %v1092_v43 = vadd.f32 %v2915_v40, %v3376_v8  ;;  %v1083_v45 = vpop.f32.mrb[5].mxu1  ;;  %v2632_v46 = vpack.c.bf16 %v1581_v41, %v1581_v41  ;;  %vm1323_vm7 = vcmp.ge.f32.partialorder %v815_v37, 0.0  ;;  %v1451_v48 = vmul.f32 0.2, %v815_v37 }
 0x130   : > { %v1645_v47 = vsel %vm1389_vm6, %v1079_v26, %v1517_v36  ;;  %v2852_v49 = vpop.f32.mrb[6].mxu0  ;;  %v2916_v50 = vpop.f32.mrb[6].mxu1  ;;  %vm1387_vm8 = vcmp.ge.f32.partialorder %v1071_v38, 0.0  ;;  %v1515_v52 = vmul.f32 0.2, %v1071_v38  ;;  %vm1328_vm9 = vcmp.ge.f32.partialorder %v836_v42, 0.0 }
 0x131   : > { %v2696_v51 = vpack.c.bf16 %v1645_v47, %v1645_v47  ;;  %v830_v53 = vpop.f32.mrb[7].mxu0  ;;  %v1086_v54 = vpop.f32.mrb[7].mxu1  ;;  %2222 = vst.msk [vmem:[%s3385_s28 + $0xc] sm:$0xf] %vm2218_vm0, %v2632_v46  ;;  %v1579_v55 = vsel %vm1323_vm7, %v815_v37, %v1451_v48  ;;  %v1456_v56 = vmul.f32 0.2, %v836_v42  ;;  %v828_v60 = vadd.f32 %v3376_v8, %v827_v44 }
 0x132   : > { %vm1392_vm10 = vcmp.ge.f32.partialorder %v1092_v43, 0.0  ;;  %v1520_v57 = vmul.f32 0.2, %v1092_v43  ;;  %v2630_v58 = vpack.c.bf16 %v1579_v55, %v1579_v55  ;;  %v1643_v59 = vsel %vm1387_vm8, %v1071_v38, %v1515_v52 }
 0x133   : > { %2286 = vst.msk [vmem:[%s3385_s28 + $0x10c] sm:$0xf] %vm2218_vm0, %v2696_v51  ;;  %v1084_v61 = vadd.f32 %v3376_v8, %v1083_v45  ;;  %v2694_v62 = vpack.c.bf16 %v1643_v59, %v1643_v59  ;;  %v1584_v63 = vsel %vm1328_vm9, %v836_v42, %v1456_v56  ;;  %v839_v1 = vadd.f32 %v2852_v49, %v3376_v8 }
 0x134   : > { %v1648_v0 = vsel %vm1392_vm10, %v1092_v43, %v1520_v57  ;;  %2220 = vst.msk [vmem:[%s3385_s28 + $0x4] sm:$0xf] %vm2218_vm0, %v2630_v58  ;;  %v2635_v2 = vpack.c.bf16 %v1584_v63, %v1584_v63  ;;  %vm1326_vm11 = vcmp.ge.f32.partialorder %v828_v60, 0.0  ;;  %v1454_v4 = vmul.f32 0.2, %v828_v60 }
 0x135   : > { %v2699_v3 = vpack.c.bf16 %v1648_v0, %v1648_v0  ;;  %2284 = vst.msk [vmem:[%s3385_s28 + $0x104] sm:$0xf] %vm2218_vm0, %v2694_v62  ;;  %vm1390_vm12 = vcmp.ge.f32.partialorder %v1084_v61, 0.0  ;;  %v1518_v5 = vmul.f32 0.2, %v1084_v61  ;;  %vm1329_vm13 = vcmp.ge.f32.partialorder %v839_v1, 0.0 }
 0x136   : > { %v1457_v6 = vmul.f32 0.2, %v839_v1  ;;  %2225 = vst.msk [vmem:[%s3385_s28 + $0x18] sm:$0xf] %vm2218_vm0, %v2635_v2  ;;  %v1582_v7 = vsel %vm1326_vm11, %v828_v60, %v1454_v4  ;;  %v1095_v9 = vadd.f32 %v2916_v50, %v3376_v8  ;;  %v831_v10 = vadd.f32 %v3376_v8, %v830_v53  ;;  %v2855_v12 = vpop.f32.mrb[8].mxu0  ;;  %v2919_v13 = vpop.f32.mrb[8].mxu1 }
 0x137   : > { %2289 = vst.msk [vmem:[%s3385_s28 + $0x118] sm:$0xf] %vm2218_vm0, %v2699_v3  ;;  %v1087_v11 = vadd.f32 %v3376_v8, %v1086_v54  ;;  %v2633_v14 = vpack.c.bf16 %v1582_v7, %v1582_v7  ;;  %v1646_v15 = vsel %vm1390_vm12, %v1084_v61, %v1518_v5  ;;  %v852_v17 = vadd.f32 %v2855_v12, %v3376_v8  ;;  %v843_v18 = vpop.f32.mrb[9].mxu0  ;;  %v1099_v19 = vpop.f32.mrb[9].mxu1 }
 0x138   : > { %v1585_v16 = vsel %vm1329_vm13, %v839_v1, %v1457_v6  ;;  %v2697_v20 = vpack.c.bf16 %v1646_v15, %v1646_v15  ;;  %vm1393_vm14 = vcmp.ge.f32.partialorder %v1095_v9, 0.0  ;;  %v1521_v22 = vmul.f32 0.2, %v1095_v9  ;;  %v2856_v23 = vpop.f32.mrb[10].mxu0  ;;  %v2920_v24 = vpop.f32.mrb[10].mxu1 }
 0x139   : > { %v2636_v21 = vpack.c.bf16 %v1585_v16, %v1585_v16  ;;  %2223 = vst.msk [vmem:[%s3385_s28 + $0x10] sm:$0xf] %vm2218_vm0, %v2633_v14  ;;  %vm1327_vm15 = vcmp.ge.f32.partialorder %v831_v10, 0.0  ;;  %v1455_v25 = vmul.f32 0.2, %v831_v10  ;;  %vm1391_vm1 = vcmp.ge.f32.partialorder %v1087_v11, 0.0 }
 0x13a   : > { %v1519_v26 = vmul.f32 0.2, %v1087_v11  ;;  %2287 = vst.msk [vmem:[%s3385_s28 + $0x110] sm:$0xf] %vm2218_vm0, %v2697_v20  ;;  %v1649_v27 = vsel %vm1393_vm14, %v1095_v9, %v1521_v22  ;;  %vm1332_vm2 = vcmp.ge.f32.partialorder %v852_v17, 0.0  ;;  %v1108_v29 = vadd.f32 %v2919_v13, %v3376_v8  ;;  %v846_v30 = vpop.f32.mrb[11].mxu0 }
 0x13b   : > { %2226 = vst.msk [vmem:[%s3385_s28 + $0x1c] sm:$0xf] %vm2218_vm0, %v2636_v21  ;;  %v1460_v28 = vmul.f32 0.2, %v852_v17  ;;  %v1102_v31 = vpop.f32.mrb[11].mxu1  ;;  %v2700_v32 = vpack.c.bf16 %v1649_v27, %v1649_v27  ;;  %v1583_v33 = vsel %vm1327_vm15, %v831_v10, %v1455_v25  ;;  %v844_v35 = vadd.f32 %v3376_v8, %v843_v18 }
 0x13c   : > { %v1647_v34 = vsel %vm1391_vm1, %v1087_v11, %v1519_v26  ;;  %v2634_v36 = vpack.c.bf16 %v1583_v33, %v1583_v33  ;;  %vm1396_vm3 = vcmp.ge.f32.partialorder %v1108_v29, 0.0  ;;  %v1524_v40 = vmul.f32 0.2, %v1108_v29 }
 0x13d   : > { %v2698_v37 = vpack.c.bf16 %v1647_v34, %v1647_v34  ;;  %v1588_v38 = vsel %vm1332_vm2, %v852_v17, %v1460_v28  ;;  %2290 = vst.msk [vmem:[%s3385_s28 + $0x11c] sm:$0xf] %vm2218_vm0, %v2700_v32  ;;  %vm1330_vm4 = vcmp.ge.f32.partialorder %v844_v35, 0.0  ;;  %v1458_v41 = vmul.f32 0.2, %v844_v35  ;;  %v2859_v42 = vpop.f32.mrb[12].mxu0 }
 0x13e   : > { %v2639_v39 = vpack.c.bf16 %v1588_v38, %v1588_v38  ;;  %2224 = vst.msk [vmem:[%s3385_s28 + $0x14] sm:$0xf] %vm2218_vm0, %v2634_v36  ;;  %v1100_v43 = vadd.f32 %v3376_v8, %v1099_v19  ;;  %v855_v44 = vadd.f32 %v2856_v23, %v3376_v8  ;;  %v1111_v45 = vadd.f32 %v2920_v24, %v3376_v8  ;;  %v2923_v47 = vpop.f32.mrb[12].mxu1  ;;  %v859_v48 = vpop.f32.mrb[13].mxu0 }
 0x13f   : > { %2288 = vst.msk [vmem:[%s3385_s28 + $0x114] sm:$0xf] %vm2218_vm0, %v2698_v37  ;;  %v847_v46 = vadd.f32 %v3376_v8, %v846_v30  ;;  %v1652_v49 = vsel %vm1396_vm3, %v1108_v29, %v1524_v40  ;;  %v1586_v50 = vsel %vm1330_vm4, %v844_v35, %v1458_v41  ;;  %v1103_v51 = vadd.f32 %v3376_v8, %v1102_v31  ;;  %v1115_v53 = vpop.f32.mrb[13].mxu1  ;;  %v2860_v54 = vpop.f32.mrb[14].mxu0 }
 0x140   : > { %2229 = vst.msk [vmem:[%s3385_s28 + $0x28] sm:$0xf] %vm2218_vm0, %v2639_v39  ;;  %v868_v52 = vadd.f32 %v2859_v42, %v3376_v8  ;;  %v2703_v55 = vpack.c.bf16 %v1652_v49, %v1652_v49  ;;  %v2637_v56 = vpack.c.bf16 %v1586_v50, %v1586_v50  ;;  %vm1394_vm5 = vcmp.ge.f32.partialorder %v1100_v43, 0.0  ;;  %v2924_v58 = vpop.f32.mrb[14].mxu1  ;;  %v862_v59 = vpop.f32.mrb[15].mxu0 }
 0x141   : > { %v1522_v57 = vmul.f32 0.2, %v1100_v43  ;;  %vm1333_vm6 = vcmp.ge.f32.partialorder %v855_v44, 0.0  ;;  %v1461_v60 = vmul.f32 0.2, %v855_v44  ;;  %vm1397_vm7 = vcmp.ge.f32.partialorder %v1111_v45, 0.0 }
 0x142   : > { %v1525_v61 = vmul.f32 0.2, %v1111_v45  ;;  %2293 = vst.msk [vmem:[%s3385_s28 + $0x128] sm:$0xf] %vm2218_vm0, %v2703_v55  ;;  %2227 = vst.msk [vmem:[%s3385_s28 + $0x20] sm:$0xf] %vm2218_vm0, %v2637_v56  ;;  %v1124_v12 = vadd.f32 %v2923_v47, %v3376_v8  ;;  %v860_v16 = vadd.f32 %v3376_v8, %v859_v48  ;;  %v1116_v17 = vadd.f32 %v3376_v8, %v1115_v53 }
 0x143   : > { %v1650_v62 = vsel %vm1394_vm5, %v1100_v43, %v1522_v57  ;;  %vm1331_vm8 = vcmp.ge.f32.partialorder %v847_v46, 0.0  ;;  %v1459_v63 = vmul.f32 0.2, %v847_v46  ;;  %vm1395_vm9 = vcmp.ge.f32.partialorder %v1103_v51, 0.0  ;;  %v1118_v0 = vpop.f32.mrb[15].mxu1 }
 0x144   : > { %v2701_v1 = vpack.c.bf16 %v1650_v62, %v1650_v62  ;;  %v1589_v2 = vsel %vm1333_vm6, %v855_v44, %v1461_v60  ;;  %v1653_v3 = vsel %vm1397_vm7, %v1111_v45, %v1525_v61  ;;  %v1523_v4 = vmul.f32 0.2, %v1103_v51 }
 0x145   : > { %v2640_v5 = vpack.c.bf16 %v1589_v2, %v1589_v2  ;;  %v2704_v6 = vpack.c.bf16 %v1653_v3, %v1653_v3  ;;  %v1587_v7 = vsel %vm1331_vm8, %v847_v46, %v1459_v63  ;;  %vm1336_vm10 = vcmp.ge.f32.partialorder %v868_v52, 0.0  ;;  %v2863_v13 = vpop.f32.mrb[16].mxu0  ;;  %v2927_v14 = vpop.f32.mrb[16].mxu1 }
 0x146   : > { %2291 = vst.msk [vmem:[%s3385_s28 + $0x120] sm:$0xf] %vm2218_vm0, %v2701_v1  ;;  %v2638_v9 = vpack.c.bf16 %v1587_v7, %v1587_v7  ;;  %v1651_v10 = vsel %vm1395_vm9, %v1103_v51, %v1523_v4  ;;  %v1464_v11 = vmul.f32 0.2, %v868_v52  ;;  %v871_v18 = vadd.f32 %v2860_v54, %v3376_v8  ;;  %v875_v19 = vpop.f32.mrb[17].mxu0  ;;  %v1131_v20 = vpop.f32.mrb[17].mxu1 }
 0x147   : > { %2230 = vst.msk [vmem:[%s3385_s28 + $0x2c] sm:$0xf] %vm2218_vm0, %v2640_v5  ;;  %2294 = vst.msk [vmem:[%s3385_s28 + $0x12c] sm:$0xf] %vm2218_vm0, %v2704_v6  ;;  %v2702_v15 = vpack.c.bf16 %v1651_v10, %v1651_v10  ;;  %vm1400_vm11 = vcmp.ge.f32.partialorder %v1124_v12, 0.0  ;;  %v1127_v23 = vadd.f32 %v2924_v58, %v3376_v8  ;;  %v3461_v24 = vpop.f32.mrb[18].mxu0  ;;  %v863_v39 = vadd.f32 %v3376_v8, %v862_v59 }
 0x148   : > { %2228 = vst.msk [vmem:[%s3385_s28 + $0x24] sm:$0xf] %vm2218_vm0, %v2638_v9  ;;  %v1592_v21 = vsel %vm1336_vm10, %v868_v52, %v1464_v11  ;;  %v1528_v22 = vmul.f32 0.2, %v1124_v12  ;;  %v3463_v25 = vpop.f32.mrb[18].mxu1  ;;  %vm1334_vm12 = vcmp.ge.f32.partialorder %v860_v16, 0.0  ;;  %v1119_v43 = vadd.f32 %v3376_v8, %v1118_v0 }
 0x149   : > { %2292 = vst.msk [vmem:[%s3385_s28 + $0x124] sm:$0xf] %vm2218_vm0, %v2702_v15  ;;  %v2643_v26 = vpack.c.bf16 %v1592_v21, %v1592_v21  ;;  %v1462_v27 = vmul.f32 0.2, %v860_v16  ;;  %vm1398_vm13 = vcmp.ge.f32.partialorder %v1116_v17, 0.0  ;;  %v3467_v28 = vpop.f32.mrb[19].mxu0  ;;  %v884_v46 = vadd.f32 %v2863_v13, %v3376_v8 }
 0x14a   : > { %v3469_v29 = vpop.f32.mrb[19].mxu1  ;;  %v1656_v30 = vsel %vm1400_vm11, %v1124_v12, %v1528_v22  ;;  %v1526_v31 = vmul.f32 0.2, %v1116_v17  ;;  %vm1337_vm14 = vcmp.ge.f32.partialorder %v871_v18, 0.0  ;;  %v1465_v32 = vmul.f32 0.2, %v871_v18 }
 0x14b   : > { %2233 = vst.msk [vmem:[%s3385_s28 + $0x38] sm:$0xf] %vm2218_vm0, %v2643_v26  ;;  %v2707_v33 = vpack.c.bf16 %v1656_v30, %v1656_v30  ;;  %v1590_v34 = vsel %vm1334_vm12, %v860_v16, %v1462_v27  ;;  %vm1401_vm15 = vcmp.ge.f32.partialorder %v1127_v23, 0.0  ;;  %v1529_v35 = vmul.f32 0.2, %v1127_v23 }
 0x14c   : > { %v2641_v36 = vpack.c.bf16 %v1590_v34, %v1590_v34  ;;  %v1654_v37 = vsel %vm1398_vm13, %v1116_v17, %v1526_v31  ;;  %v1593_v38 = vsel %vm1337_vm14, %v871_v18, %v1465_v32  ;;  %vm1335_vm1 = vcmp.ge.f32.partialorder %v863_v39, 0.0 }
 0x14d   : > { %2297 = vst.msk [vmem:[%s3385_s28 + $0x138] sm:$0xf] %vm2218_vm0, %v2707_v33  ;;  %v2705_v40 = vpack.c.bf16 %v1654_v37, %v1654_v37  ;;  %v2644_v41 = vpack.c.bf16 %v1593_v38, %v1593_v38  ;;  %v1657_v42 = vsel %vm1401_vm15, %v1127_v23, %v1529_v35  ;;  %v1463_v45 = vmul.f32 0.2, %v863_v39  ;;  %v2867_v47 = vpop.f32.mrb[20].mxu0  ;;  %v2931_v48 = vpop.f32.mrb[20].mxu1 }
 0x14e   : > { %2231 = vst.msk [vmem:[%s3385_s28 + $0x30] sm:$0xf] %vm2218_vm0, %v2641_v36  ;;  %v2708_v44 = vpack.c.bf16 %v1657_v42, %v1657_v42  ;;  %vm1399_vm2 = vcmp.ge.f32.partialorder %v1119_v43, 0.0  ;;  %v1527_v49 = vmul.f32 0.2, %v1119_v43  ;;  %v1140_v50 = vadd.f32 %v2927_v14, %v3376_v8  ;;  %v891_v52 = vpop.f32.mrb[21].mxu0 }
 0x14f   : > { %2295 = vst.msk [vmem:[%s3385_s28 + $0x130] sm:$0xf] %vm2218_vm0, %v2705_v40  ;;  %2234 = vst.msk [vmem:[%s3385_s28 + $0x3c] sm:$0xf] %vm2218_vm0, %v2644_v41  ;;  %v876_v51 = vadd.f32 %v3376_v8, %v875_v19  ;;  %v3486_v53 = vpop.f32.mrb[21].mxu1  ;;  %v1591_v54 = vsel %vm1335_vm1, %v863_v39, %v1463_v45  ;;  %vm1340_vm3 = vcmp.ge.f32.partialorder %v884_v46, 0.0  ;;  %v1132_v56 = vadd.f32 %v3376_v8, %v1131_v20 }
 0x150   : > { %2298 = vst.msk [vmem:[%s3385_s28 + $0x13c] sm:$0xf] %vm2218_vm0, %v2708_v44  ;;  %v1468_v55 = vmul.f32 0.2, %v884_v46  ;;  %v3491_v57 = vpop.f32.mrb[22].mxu0  ;;  %v3493_v58 = vpop.f32.mrb[22].mxu1  ;;  %v2642_v59 = vpack.c.bf16 %v1591_v54, %v1591_v54  ;;  %v1655_v60 = vsel %vm1399_vm2, %v1119_v43, %v1527_v49  ;;  %v887_v9 = vadd.f32 %v3461_v24, %v3376_v8 }
 0x151   : > { %vm1404_vm4 = vcmp.ge.f32.partialorder %v1140_v50, 0.0  ;;  %v1532_v61 = vmul.f32 0.2, %v1140_v50  ;;  %v3495_v62 = vpop.f32.mrb[23].mxu0  ;;  %v3497_v63 = vpop.f32.mrb[23].mxu1  ;;  %v2706_v0 = vpack.c.bf16 %v1655_v60, %v1655_v60  ;;  %vm1338_vm5 = vcmp.ge.f32.partialorder %v876_v51, 0.0 }
 0x152   : > { %v1596_v1 = vsel %vm1340_vm3, %v884_v46, %v1468_v55  ;;  %v1466_v2 = vmul.f32 0.2, %v876_v51  ;;  %2232 = vst.msk [vmem:[%s3385_s28 + $0x34] sm:$0xf] %vm2218_vm0, %v2642_v59  ;;  %vm1402_vm6 = vcmp.ge.f32.partialorder %v1132_v56, 0.0  ;;  %v1143_v10 = vadd.f32 %v3463_v25, %v3376_v8 }
 0x153   : > { %v2647_v3 = vpack.c.bf16 %v1596_v1, %v1596_v1  ;;  %v1660_v4 = vsel %vm1404_vm4, %v1140_v50, %v1532_v61  ;;  %v1530_v5 = vmul.f32 0.2, %v1132_v56  ;;  %2296 = vst.msk [vmem:[%s3385_s28 + $0x134] sm:$0xf] %vm2218_vm0, %v2706_v0  ;;  %v879_v13 = vadd.f32 %v3376_v8, %v3467_v28 }
 0x154   : > { %v2711_v6 = vpack.c.bf16 %v1660_v4, %v1660_v4  ;;  %v1594_v7 = vsel %vm1338_vm5, %v876_v51, %v1466_v2  ;;  %v1135_v14 = vadd.f32 %v3376_v8, %v3469_v29  ;;  %vm1341_vm7 = vcmp.ge.f32.partialorder %v887_v9, 0.0 }
 0x155   : > { %2237 = vst.msk [vmem:[%s3385_s28 + $0x48] sm:$0xf] %vm2218_vm0, %v2647_v3  ;;  %v2645_v11 = vpack.c.bf16 %v1594_v7, %v1594_v7  ;;  %v1658_v12 = vsel %vm1402_vm6, %v1132_v56, %v1530_v5  ;;  %v1469_v16 = vmul.f32 0.2, %v887_v9  ;;  %vm1405_vm8 = vcmp.ge.f32.partialorder %v1143_v10, 0.0  ;;  %v3515_v17 = vpop.f32.mrb[24].mxu0 }
 0x156   : > { %2301 = vst.msk [vmem:[%s3385_s28 + $0x148] sm:$0xf] %vm2218_vm0, %v2711_v6  ;;  %v2709_v15 = vpack.c.bf16 %v1658_v12, %v1658_v12  ;;  %v3517_v18 = vpop.f32.mrb[24].mxu1  ;;  %v1533_v19 = vmul.f32 0.2, %v1143_v10  ;;  %vm1339_vm9 = vcmp.ge.f32.partialorder %v879_v13, 0.0  ;;  %v900_v23 = vadd.f32 %v2867_v47, %v3376_v8 }
 0x157   : > { %2235 = vst.msk [vmem:[%s3385_s28 + $0x40] sm:$0xf] %vm2218_vm0, %v2645_v11  ;;  %v1467_v20 = vmul.f32 0.2, %v879_v13  ;;  %vm1403_vm10 = vcmp.ge.f32.partialorder %v1135_v14, 0.0  ;;  %v1597_v21 = vsel %vm1341_vm7, %v887_v9, %v1469_v16  ;;  %v1156_v24 = vadd.f32 %v2931_v48, %v3376_v8  ;;  %v3525_v25 = vpop.f32.mrb[25].mxu0 }
 0x158   : > { %2299 = vst.msk [vmem:[%s3385_s28 + $0x140] sm:$0xf] %vm2218_vm0, %v2709_v15  ;;  %v1531_v22 = vmul.f32 0.2, %v1135_v14  ;;  %v3527_v26 = vpop.f32.mrb[25].mxu1  ;;  %v2648_v27 = vpack.c.bf16 %v1597_v21, %v1597_v21  ;;  %v1661_v28 = vsel %vm1405_vm8, %v1143_v10, %v1533_v19  ;;  %v892_v30 = vadd.f32 %v3376_v8, %v891_v52  ;;  %v3531_v31 = vpop.f32.mrb[26].mxu0 }
 0x159   : > { %v1595_v29 = vsel %vm1339_vm9, %v879_v13, %v1467_v20  ;;  %v3533_v32 = vpop.f32.mrb[26].mxu1  ;;  %v2712_v33 = vpack.c.bf16 %v1661_v28, %v1661_v28  ;;  %vm1344_vm11 = vcmp.ge.f32.partialorder %v900_v23, 0.0  ;;  %v3536_v36 = vpop.f32.mrb[27].mxu0  ;;  %v1472_v39 = vmul.f32 0.2, %v900_v23 }
 0x15a   : > { %v2646_v34 = vpack.c.bf16 %v1595_v29, %v1595_v29  ;;  %v1659_v35 = vsel %vm1403_vm10, %v1135_v14, %v1531_v22  ;;  %v3538_v37 = vpop.f32.mrb[27].mxu1  ;;  %2238 = vst.msk [vmem:[%s3385_s28 + $0x4c] sm:$0xf] %vm2218_vm0, %v2648_v27  ;;  %vm1408_vm12 = vcmp.ge.f32.partialorder %v1156_v24, 0.0  ;;  %v1536_v40 = vmul.f32 0.2, %v1156_v24 }
 0x15b   : > { %v2710_v38 = vpack.c.bf16 %v1659_v35, %v1659_v35  ;;  %2302 = vst.msk [vmem:[%s3385_s28 + $0x14c] sm:$0xf] %vm2218_vm0, %v2712_v33  ;;  %vm1342_vm13 = vcmp.ge.f32.partialorder %v892_v30, 0.0  ;;  %v1470_v41 = vmul.f32 0.2, %v892_v30  ;;  %v1148_v42 = vadd.f32 %v3376_v8, %v3486_v53 }
 0x15c   : > { %2236 = vst.msk [vmem:[%s3385_s28 + $0x44] sm:$0xf] %vm2218_vm0, %v2646_v34  ;;  %v903_v43 = vadd.f32 %v3491_v57, %v3376_v8  ;;  %v1600_v44 = vsel %vm1344_vm11, %v900_v23, %v1472_v39  ;;  %v1664_v45 = vsel %vm1408_vm12, %v1156_v24, %v1536_v40  ;;  %v1159_v46 = vadd.f32 %v3493_v58, %v3376_v8 }
 0x15d   : > { %2300 = vst.msk [vmem:[%s3385_s28 + $0x144] sm:$0xf] %vm2218_vm0, %v2710_v38  ;;  %v895_v47 = vadd.f32 %v3376_v8, %v3495_v62  ;;  %v2651_v48 = vpack.c.bf16 %v1600_v44, %v1600_v44  ;;  %v2715_v49 = vpack.c.bf16 %v1664_v45, %v1664_v45  ;;  %v1598_v50 = vsel %vm1342_vm13, %v892_v30, %v1470_v41  ;;  %v3556_v51 = vpop.f32.mrb[28].mxu0  ;;  %v3558_v52 = vpop.f32.mrb[28].mxu1 }
 0x15e   : > { %vm1406_vm14 = vcmp.ge.f32.partialorder %v1148_v42, 0.0  ;;  %v2649_v53 = vpack.c.bf16 %v1598_v50, %v1598_v50  ;;  %v1534_v54 = vmul.f32 0.2, %v1148_v42  ;;  %vm1345_vm15 = vcmp.ge.f32.partialorder %v903_v43, 0.0  ;;  %v3560_v56 = vpop.f32.mrb[29].mxu0  ;;  %v3572_v0 = vpop.f32.mrb[29].mxu1 }
 0x15f   : > { %v1473_v55 = vmul.f32 0.2, %v903_v43  ;;  %2241 = vst.msk [vmem:[%s3385_s28 + $0x58] sm:$0xf] %vm2218_vm0, %v2651_v48  ;;  %2305 = vst.msk [vmem:[%s3385_s28 + $0x158] sm:$0xf] %vm2218_vm0, %v2715_v49  ;;  %v1151_v61 = vadd.f32 %v3376_v8, %v3497_v63  ;;  %v916_v62 = vadd.f32 %v3515_v17, %v3376_v8  ;;  %v1172_v13 = vadd.f32 %v3517_v18, %v3376_v8 }
 0x160   : > { %vm1409_vm1 = vcmp.ge.f32.partialorder %v1159_v46, 0.0  ;;  %v1537_v57 = vmul.f32 0.2, %v1159_v46  ;;  %vm1343_vm2 = vcmp.ge.f32.partialorder %v895_v47, 0.0  ;;  %v1471_v58 = vmul.f32 0.2, %v895_v47 }
 0x161   : > { %2239 = vst.msk [vmem:[%s3385_s28 + $0x50] sm:$0xf] %vm2218_vm0, %v2649_v53  ;;  %v1662_v59 = vsel %vm1406_vm14, %v1148_v42, %v1534_v54  ;;  %v1601_v60 = vsel %vm1345_vm15, %v903_v43, %v1473_v55  ;;  %v3574_v1 = vpop.f32.mrb[30].mxu0  ;;  %v3576_v6 = vpop.f32.mrb[30].mxu1  ;;  %vm1407_vm3 = vcmp.ge.f32.partialorder %v1151_v61, 0.0  ;;  %vm1348_vm4 = vcmp.ge.f32.partialorder %v916_v62, 0.0 }
 0x162   : > { %v2713_v2 = vpack.c.bf16 %v1662_v59, %v1662_v59  ;;  %v2652_v3 = vpack.c.bf16 %v1601_v60, %v1601_v60  ;;  %v1665_v4 = vsel %vm1409_vm1, %v1159_v46, %v1537_v57  ;;  %v1599_v5 = vsel %vm1343_vm2, %v895_v47, %v1471_v58  ;;  %v3578_v7 = vpop.f32.mrb[31].mxu0  ;;  %v3580_v11 = vpop.f32.mrb[31].mxu1 }
 0x163   : > { %v2716_v9 = vpack.c.bf16 %v1665_v4, %v1665_v4  ;;  %v2650_v63 = vpack.c.bf16 %v1599_v5, %v1599_v5  ;;  %v1535_v10 = vmul.f32 0.2, %v1151_v61  ;;  %v1476_v12 = vmul.f32 0.2, %v916_v62 }
 0x164   : > { %2303 = vst.msk [vmem:[%s3385_s28 + $0x150] sm:$0xf] %vm2218_vm0, %v2713_v2  ;;  %2242 = vst.msk [vmem:[%s3385_s28 + $0x5c] sm:$0xf] %vm2218_vm0, %v2652_v3  ;;  %v908_v14 = vadd.f32 %v3376_v8, %v3525_v25  ;;  %v1164_v16 = vadd.f32 %v3376_v8, %v3527_v26  ;;  %v919_v17 = vadd.f32 %v3531_v31, %v3376_v8  ;;  %vm1412_vm5 = vcmp.ge.f32.partialorder %v1172_v13, 0.0 }
 0x165   : > { %2306 = vst.msk [vmem:[%s3385_s28 + $0x15c] sm:$0xf] %vm2218_vm0, %v2716_v9  ;;  %2240 = vst.msk [vmem:[%s3385_s28 + $0x54] sm:$0xf] %vm2218_vm0, %v2650_v63  ;;  %v1663_v15 = vsel %vm1407_vm3, %v1151_v61, %v1535_v10  ;;  %v1175_v19 = vadd.f32 %v3533_v32, %v3376_v8  ;;  %v1604_v18 = vsel %vm1348_vm4, %v916_v62, %v1476_v12  ;;  %v1540_v21 = vmul.f32 0.2, %v1172_v13 }
 0x166   : > { %v2714_v20 = vpack.c.bf16 %v1663_v15, %v1663_v15  ;;  %v3600_v22 = vpop.f32.mrb[32].mxu0  ;;  %v3602_v23 = vpop.f32.mrb[32].mxu1  ;;  %v2655_v24 = vpack.c.bf16 %v1604_v18, %v1604_v18  ;;  %vm1346_vm6 = vcmp.ge.f32.partialorder %v908_v14, 0.0  ;;  %v1474_v25 = vmul.f32 0.2, %v908_v14 }
 0x167   : > { %vm1410_vm7 = vcmp.ge.f32.partialorder %v1164_v16, 0.0  ;;  %v3604_v26 = vpop.f32.mrb[33].mxu0  ;;  %v3606_v27 = vpop.f32.mrb[33].mxu1  ;;  %v1668_v28 = vsel %vm1412_vm5, %v1172_v13, %v1540_v21  ;;  %v1538_v29 = vmul.f32 0.2, %v1164_v16  ;;  %vm1349_vm8 = vcmp.ge.f32.partialorder %v919_v17, 0.0 }
 0x168   : > { %2304 = vst.msk [vmem:[%s3385_s28 + $0x154] sm:$0xf] %vm2218_vm0, %v2714_v20  ;;  %v1477_v30 = vmul.f32 0.2, %v919_v17  ;;  %v3610_v31 = vpop.f32.mrb[34].mxu0  ;;  %v2719_v32 = vpack.c.bf16 %v1668_v28, %v1668_v28  ;;  %v1602_v33 = vsel %vm1346_vm6, %v908_v14, %v1474_v25  ;;  %vm1413_vm9 = vcmp.ge.f32.partialorder %v1175_v19, 0.0 }
 0x169   : > { %2245 = vst.msk [vmem:[%s3385_s28 + $0x68] sm:$0xf] %vm2218_vm0, %v2655_v24  ;;  %v1541_v34 = vmul.f32 0.2, %v1175_v19  ;;  %v3614_v35 = vpop.f32.mrb[34].mxu1  ;;  %v3616_v38 = vpop.f32.mrb[35].mxu0  ;;  %v2653_v39 = vpack.c.bf16 %v1602_v33, %v1602_v33  ;;  %v1666_v40 = vsel %vm1410_vm7, %v1164_v16, %v1538_v29  ;;  %v911_v42 = vadd.f32 %v3376_v8, %v3536_v36 }
 0x16a   : > { %v1605_v41 = vsel %vm1349_vm8, %v919_v17, %v1477_v30  ;;  %v3621_v43 = vpop.f32.mrb[35].mxu1  ;;  %2309 = vst.msk [vmem:[%s3385_s28 + $0x168] sm:$0xf] %vm2218_vm0, %v2719_v32  ;;  %v2717_v44 = vpack.c.bf16 %v1666_v40, %v1666_v40  ;;  %v1167_v47 = vadd.f32 %v3376_v8, %v3538_v37  ;;  %v932_v50 = vadd.f32 %v3556_v51, %v3376_v8 }
 0x16b   : > { %v2656_v45 = vpack.c.bf16 %v1605_v41, %v1605_v41  ;;  %v1669_v46 = vsel %vm1413_vm9, %v1175_v19, %v1541_v34  ;;  %2243 = vst.msk [vmem:[%s3385_s28 + $0x60] sm:$0xf] %vm2218_vm0, %v2653_v39  ;;  %vm1347_vm10 = vcmp.ge.f32.partialorder %v911_v42, 0.0  ;;  %v1475_v49 = vmul.f32 0.2, %v911_v42 }
 0x16c   : > { %v2720_v48 = vpack.c.bf16 %v1669_v46, %v1669_v46  ;;  %2307 = vst.msk [vmem:[%s3385_s28 + $0x160] sm:$0xf] %vm2218_vm0, %v2717_v44  ;;  %vm1411_vm11 = vcmp.ge.f32.partialorder %v1167_v47, 0.0  ;;  %v1539_v36 = vmul.f32 0.2, %v1167_v47  ;;  %v1188_v53 = vadd.f32 %v3558_v52, %v3376_v8 }
 0x16d   : > { %2246 = vst.msk [vmem:[%s3385_s28 + $0x6c] sm:$0xf] %vm2218_vm0, %v2656_v45  ;;  %v924_v37 = vadd.f32 %v3376_v8, %v3560_v56  ;;  %v1603_v54 = vsel %vm1347_vm10, %v911_v42, %v1475_v49  ;;  %vm1352_vm12 = vcmp.ge.f32.partialorder %v932_v50, 0.0  ;;  %v1480_v55 = vmul.f32 0.2, %v932_v50  ;;  %v3643_v57 = vpop.f32.mrb[36].mxu0 }
 0x16e   : > { %2310 = vst.msk [vmem:[%s3385_s28 + $0x16c] sm:$0xf] %vm2218_vm0, %v2720_v48  ;;  %v1180_v51 = vadd.f32 %v3376_v8, %v3572_v0  ;;  %v3645_v58 = vpop.f32.mrb[36].mxu1  ;;  %v2654_v59 = vpack.c.bf16 %v1603_v54, %v1603_v54  ;;  %v1667_v60 = vsel %vm1411_vm11, %v1167_v47, %v1539_v36  ;;  %vm1416_vm13 = vcmp.ge.f32.partialorder %v1188_v53, 0.0  ;;  %v3647_v61 = vpop.f32.mrb[37].mxu0 }
 0x16f   : > { %v1544_v52 = vmul.f32 0.2, %v1188_v53  ;;  %v3649_v56 = vpop.f32.mrb[37].mxu1  ;;  %v2718_v62 = vpack.c.bf16 %v1667_v60, %v1667_v60  ;;  %v1608_v2 = vsel %vm1352_vm12, %v932_v50, %v1480_v55  ;;  %vm1350_vm14 = vcmp.ge.f32.partialorder %v924_v37, 0.0  ;;  %v3651_v4 = vpop.f32.mrb[38].mxu0 }
 0x170   : > { %v1478_v3 = vmul.f32 0.2, %v924_v37  ;;  %v3653_v0 = vpop.f32.mrb[38].mxu1  ;;  %2244 = vst.msk [vmem:[%s3385_s28 + $0x64] sm:$0xf] %vm2218_vm0, %v2654_v59  ;;  %v2659_v5 = vpack.c.bf16 %v1608_v2, %v1608_v2  ;;  %vm1414_vm15 = vcmp.ge.f32.partialorder %v1180_v51, 0.0  ;;  %v935_v15 = vadd.f32 %v3574_v1, %v3376_v8 }
 0x171   : > { %v1672_v9 = vsel %vm1416_vm13, %v1188_v53, %v1544_v52  ;;  %v1542_v63 = vmul.f32 0.2, %v1180_v51  ;;  %v3657_v10 = vpop.f32.mrb[39].mxu0  ;;  %v3659_v12 = vpop.f32.mrb[39].mxu1  ;;  %2308 = vst.msk [vmem:[%s3385_s28 + $0x164] sm:$0xf] %vm2218_vm0, %v2718_v62  ;;  %v1191_v16 = vadd.f32 %v3576_v6, %v3376_v8  ;;  %v927_v20 = vadd.f32 %v3376_v8, %v3578_v7 }
 0x172   : > { %v2723_v13 = vpack.c.bf16 %v1672_v9, %v1672_v9  ;;  %v1606_v14 = vsel %vm1350_vm14, %v924_v37, %v1478_v3  ;;  %2249 = vst.msk [vmem:[%s3385_s28 + $0x78] sm:$0xf] %vm2218_vm0, %v2659_v5  ;;  %v1183_v18 = vadd.f32 %v3376_v8, %v3580_v11  ;;  %vm1353_vm1 = vcmp.ge.f32.partialorder %v935_v15, 0.0 }
 0x173   : > { %v2657_v17 = vpack.c.bf16 %v1606_v14, %v1606_v14  ;;  %v1670_v19 = vsel %vm1414_vm15, %v1180_v51, %v1542_v63  ;;  %v1481_v24 = vmul.f32 0.2, %v935_v15  ;;  %vm1417_vm2 = vcmp.ge.f32.partialorder %v1191_v16, 0.0 }
 0x174   : > { %2313 = vst.msk [vmem:[%s3385_s28 + $0x178] sm:$0xf] %vm2218_vm0, %v2723_v13  ;;  %v2721_v21 = vpack.c.bf16 %v1670_v19, %v1670_v19  ;;  %v1545_v1 = vmul.f32 0.2, %v1191_v16  ;;  %vm1351_vm3 = vcmp.ge.f32.partialorder %v927_v20, 0.0  ;;  %vm1415_vm4 = vcmp.ge.f32.partialorder %v1183_v18, 0.0 }
 0x175   : > { %2247 = vst.msk [vmem:[%s3385_s28 + $0x70] sm:$0xf] %vm2218_vm0, %v2657_v17  ;;  %v1479_v6 = vmul.f32 0.2, %v927_v20  ;;  %v1609_v25 = vsel %vm1353_vm1, %v935_v15, %v1481_v24  ;;  %v1543_v28 = vmul.f32 0.2, %v1183_v18  ;;  %v948_v7 = vadd.f32 %v3600_v22, %v3376_v8 }
 0x176   : > { %2311 = vst.msk [vmem:[%s3385_s28 + $0x170] sm:$0xf] %vm2218_vm0, %v2721_v21  ;;  %v1204_v11 = vadd.f32 %v3602_v23, %v3376_v8  ;;  %v3683_v29 = vpop.f32.mrb[40].mxu0  ;;  %v3685_v30 = vpop.f32.mrb[40].mxu1  ;;  %v2660_v32 = vpack.c.bf16 %v1609_v25, %v1609_v25  ;;  %v1673_v33 = vsel %vm1417_vm2, %v1191_v16, %v1545_v1  ;;  %v940_v39 = vadd.f32 %v3376_v8, %v3604_v26  ;;  %v3748_v1 = vld [vmem:[%s4062_s2] ss:$0 sm:$0xff] }
 0x177   : > { %v1607_v34 = vsel %vm1351_vm3, %v927_v20, %v1479_v6  ;;  %v3689_v40 = vpop.f32.mrb[41].mxu0  ;;  %v3691_v41 = vpop.f32.mrb[41].mxu1  ;;  %v2724_v22 = vpack.c.bf16 %v1673_v33, %v1673_v33  ;;  %v1671_v23 = vsel %vm1415_vm4, %v1183_v18, %v1543_v28  ;;  %vm1356_vm5 = vcmp.ge.f32.partialorder %v948_v7, 0.0 }
 0x178   : > { %v2658_v42 = vpack.c.bf16 %v1607_v34, %v1607_v34  ;;  %v3694_v44 = vpop.f32.mrb[42].mxu0  ;;  %v3696_v45 = vpop.f32.mrb[42].mxu1  ;;  %2250 = vst.msk [vmem:[%s3385_s28 + $0x7c] sm:$0xf] %vm2218_vm0, %v2660_v32  ;;  %v2722_v46 = vpack.c.bf16 %v1671_v23, %v1671_v23  ;;  %v1484_v47 = vmul.f32 0.2, %v948_v7  ;;  %v1196_v50 = vadd.f32 %v3376_v8, %v3606_v27 }
 0x179   : > { %vm1420_vm6 = vcmp.ge.f32.partialorder %v1204_v11, 0.0  ;;  %v1548_v26 = vmul.f32 0.2, %v1204_v11  ;;  %v3700_v48 = vpop.f32.mrb[43].mxu0  ;;  %2314 = vst.msk [vmem:[%s3385_s28 + $0x17c] sm:$0xf] %vm2218_vm0, %v2724_v22  ;;  %v951_v36 = vadd.f32 %v3610_v31, %v3376_v8  ;;  %v1207_v55 = vadd.f32 %v3614_v35, %v3376_v8 }
 0x17a   : > { %2248 = vst.msk [vmem:[%s3385_s28 + $0x74] sm:$0xf] %vm2218_vm0, %v2658_v42  ;;  %vm1354_vm7 = vcmp.ge.f32.partialorder %v940_v39, 0.0  ;;  %v1482_v49 = vmul.f32 0.2, %v940_v39  ;;  %v3710_v53 = vpop.f32.mrb[43].mxu1  ;;  %v1612_v37 = vsel %vm1356_vm5, %v948_v7, %v1484_v47  ;;  %v943_v51 = vadd.f32 %v3376_v8, %v3616_v38 }
 0x17b   : > { %2312 = vst.msk [vmem:[%s3385_s28 + $0x174] sm:$0xf] %vm2218_vm0, %v2722_v46  ;;  %v1676_v54 = vsel %vm1420_vm6, %v1204_v11, %v1548_v26  ;;  %v2663_v27 = vpack.c.bf16 %v1612_v37, %v1612_v37  ;;  %vm1418_vm8 = vcmp.ge.f32.partialorder %v1196_v50, 0.0  ;;  %v1546_v52 = vmul.f32 0.2, %v1196_v50 }
 0x17c   : > { %v2727_v59 = vpack.c.bf16 %v1676_v54, %v1676_v54  ;;  %v1610_v60 = vsel %vm1354_vm7, %v940_v39, %v1482_v49  ;;  %vm1357_vm9 = vcmp.ge.f32.partialorder %v951_v36, 0.0  ;;  %v1485_v62 = vmul.f32 0.2, %v951_v36 }
 0x17d   : > { %v2661_v31 = vpack.c.bf16 %v1610_v60, %v1610_v60  ;;  %2253 = vst.msk [vmem:[%s3385_s28 + $0x88] sm:$0xf] %vm2218_vm0, %v2663_v27  ;;  %vm1421_vm10 = vcmp.ge.f32.partialorder %v1207_v55, 0.0  ;;  %v1549_v2 = vmul.f32 0.2, %v1207_v55  ;;  %vm1355_vm11 = vcmp.ge.f32.partialorder %v943_v51, 0.0 }
 0x17e   : > { %2317 = vst.msk [vmem:[%s3385_s28 + $0x188] sm:$0xf] %vm2218_vm0, %v2727_v59  ;;  %v1483_v35 = vmul.f32 0.2, %v943_v51  ;;  %v1674_v3 = vsel %vm1418_vm8, %v1196_v50, %v1546_v52  ;;  %v1613_v38 = vsel %vm1357_vm9, %v951_v36, %v1485_v62  ;;  %v1199_v5 = vadd.f32 %v3376_v8, %v3621_v43  ;;  %v3729_v63 = vpop.f32.mrb[44].mxu0  ;;  %v3731_v13 = vpop.f32.mrb[44].mxu1 }
 0x17f   : > { %2251 = vst.msk [vmem:[%s3385_s28 + $0x80] sm:$0xf] %vm2218_vm0, %v2661_v31  ;;  %v964_v9 = vadd.f32 %v3643_v57, %v3376_v8  ;;  %v2725_v14 = vpack.c.bf16 %v1674_v3, %v1674_v3  ;;  %v2664_v15 = vpack.c.bf16 %v1613_v38, %v1613_v38  ;;  %v1677_v16 = vsel %vm1421_vm10, %v1207_v55, %v1549_v2  ;;  %v3733_v19 = vpop.f32.mrb[45].mxu0  ;;  %v3735_v20 = vpop.f32.mrb[45].mxu1 }
 0x180   : > { %v1611_v17 = vsel %vm1355_vm11, %v943_v51, %v1483_v35  ;;  %v2728_v18 = vpack.c.bf16 %v1677_v16, %v1677_v16  ;;  %vm1419_vm12 = vcmp.ge.f32.partialorder %v1199_v5, 0.0  ;;  %v1547_v21 = vmul.f32 0.2, %v1199_v5  ;;  %v3737_v8 = vpop.f32.mrb[46].mxu0  ;;  %v3739_v57 = vpop.f32.mrb[46].mxu1 }
 0x181   : > { %v2662_v43 = vpack.c.bf16 %v1611_v17, %v1611_v17  ;;  %2315 = vst.msk [vmem:[%s3385_s28 + $0x180] sm:$0xf] %vm2218_vm0, %v2725_v14  ;;  %2254 = vst.msk [vmem:[%s3385_s28 + $0x8c] sm:$0xf] %vm2218_vm0, %v2664_v15  ;;  %vm1360_vm13 = vcmp.ge.f32.partialorder %v964_v9, 0.0  ;;  %v1220_v6 = vadd.f32 %v3748_v1, %v3645_v58  ;;  %v956_v25 = vadd.f32 %v3748_v1, %v3647_v61  ;;  %v3754_v28 = vpop.f32.mrb[47].mxu0 }
 0x182   : > { %v1488_v24 = vmul.f32 0.2, %v964_v9  ;;  %v3756_v7 = vpop.f32.mrb[47].mxu1  ;;  %2318 = vst.msk [vmem:[%s3385_s28 + $0x18c] sm:$0xf] %vm2218_vm0, %v2728_v18  ;;  %v1675_v11 = vsel %vm1419_vm12, %v1199_v5, %v1547_v21  ;;  %v1212_v32 = vadd.f32 %v3748_v1, %v3649_v56  ;;  %v967_v33 = vadd.f32 %v3748_v1, %v3651_v4 }
 0x183   : > { %2252 = vst.msk [vmem:[%s3385_s28 + $0x84] sm:$0xf] %vm2218_vm0, %v2662_v43  ;;  %v1223_v58 = vadd.f32 %v3748_v1, %v3653_v0  ;;  %v2726_v61 = vpack.c.bf16 %v1675_v11, %v1675_v11  ;;  %vm1424_vm14 = vcmp.ge.f32.partialorder %v1220_v6, 0.0  ;;  %v1552_v39 = vmul.f32 0.2, %v1220_v6 }
 0x184   : > { %v1616_v34 = vsel %vm1360_vm13, %v964_v9, %v1488_v24  ;;  %vm1358_vm15 = vcmp.ge.f32.partialorder %v956_v25, 0.0  ;;  %v1486_v42 = vmul.f32 0.2, %v956_v25  ;;  %vm1422_vm1 = vcmp.ge.f32.partialorder %v1212_v32, 0.0 }
 0x185   : > { %v2667_v22 = vpack.c.bf16 %v1616_v34, %v1616_v34  ;;  %2316 = vst.msk [vmem:[%s3385_s28 + $0x184] sm:$0xf] %vm2218_vm0, %v2726_v61  ;;  %v1680_v23 = vsel %vm1424_vm14, %v1220_v6, %v1552_v39  ;;  %v1550_v46 = vmul.f32 0.2, %v1212_v32  ;;  %vm1361_vm2 = vcmp.ge.f32.partialorder %v967_v33, 0.0  ;;  %v3770_v4 = vpop.f32.mrb[48].mxu0 }
 0x186   : > { %v1489_v56 = vmul.f32 0.2, %v967_v33  ;;  %v2731_v0 = vpack.c.bf16 %v1680_v23, %v1680_v23  ;;  %v1614_v47 = vsel %vm1358_vm15, %v956_v25, %v1486_v42  ;;  %vm1425_vm3 = vcmp.ge.f32.partialorder %v1223_v58, 0.0  ;;  %v3774_v49 = vpop.f32.mrb[48].mxu1  ;;  %v3776_v50 = vpop.f32.mrb[49].mxu0 }
 0x187   : > { %2257 = vst.msk [vmem:[%s3385_s28 + $0x98] sm:$0xf] %vm2218_vm0, %v2667_v22  ;;  %v1553_v26 = vmul.f32 0.2, %v1223_v58  ;;  %v2665_v36 = vpack.c.bf16 %v1614_v47, %v1614_v47  ;;  %v1678_v37 = vsel %vm1422_vm1, %v1212_v32, %v1550_v46  ;;  %v959_v55 = vadd.f32 %v3748_v1, %v3657_v10  ;;  %v3780_v51 = vpop.f32.mrb[49].mxu1  ;;  %v3782_v27 = vpop.f32.mrb[50].mxu0 }
 0x188   : > { %v1617_v54 = vsel %vm1361_vm2, %v967_v33, %v1489_v56  ;;  %2321 = vst.msk [vmem:[%s3385_s28 + $0x198] sm:$0xf] %vm2218_vm0, %v2731_v0  ;;  %v2729_v59 = vpack.c.bf16 %v1678_v37, %v1678_v37  ;;  %v1215_v52 = vadd.f32 %v3748_v1, %v3659_v12  ;;  %v3788_v62 = vpop.f32.mrb[50].mxu1  ;;  %v3790_v2 = vpop.f32.mrb[51].mxu0  ;;  %v980_v3 = vadd.f32 %v3748_v1, %v3683_v29 }
 0x189   : > { %v2668_v60 = vpack.c.bf16 %v1617_v54, %v1617_v54  ;;  %v1681_v31 = vsel %vm1425_vm3, %v1223_v58, %v1553_v26  ;;  %2255 = vst.msk [vmem:[%s3385_s28 + $0x90] sm:$0xf] %vm2218_vm0, %v2665_v36  ;;  %vm1359_vm4 = vcmp.ge.f32.partialorder %v959_v55, 0.0  ;;  %v1487_v35 = vmul.f32 0.2, %v959_v55  ;;  %v3796_v38 = vpop.f32.mrb[51].mxu1 }
 0x18a   : > { %v2732_v10 = vpack.c.bf16 %v1681_v31, %v1681_v31  ;;  %2319 = vst.msk [vmem:[%s3385_s28 + $0x190] sm:$0xf] %vm2218_vm0, %v2729_v59  ;;  %vm1423_vm5 = vcmp.ge.f32.partialorder %v1215_v52, 0.0  ;;  %v1551_v12 = vmul.f32 0.2, %v1215_v52  ;;  %v1236_v5 = vadd.f32 %v3748_v1, %v3685_v30 }
 0x18b   : > { %2258 = vst.msk [vmem:[%s3385_s28 + $0x9c] sm:$0xf] %vm2218_vm0, %v2668_v60  ;;  %v972_v9 = vadd.f32 %v3748_v1, %v3689_v40  ;;  %v1615_v14 = vsel %vm1359_vm4, %v959_v55, %v1487_v35  ;;  %vm1364_vm6 = vcmp.ge.f32.partialorder %v980_v3, 0.0  ;;  %v1492_v29 = vmul.f32 0.2, %v980_v3 }
 0x18c   : > { %2322 = vst.msk [vmem:[%s3385_s28 + $0x19c] sm:$0xf] %vm2218_vm0, %v2732_v10  ;;  %v1228_v15 = vadd.f32 %v3748_v1, %v3691_v41  ;;  %v2666_v16 = vpack.c.bf16 %v1615_v14, %v1615_v14  ;;  %v1679_v17 = vsel %vm1423_vm5, %v1215_v52, %v1551_v12  ;;  %vm1428_vm7 = vcmp.ge.f32.partialorder %v1236_v5, 0.0 }
 0x18d   : > { %v1556_v18 = vmul.f32 0.2, %v1236_v5  ;;  %v2730_v43 = vpack.c.bf16 %v1679_v17, %v1679_v17  ;;  %v1620_v21 = vsel %vm1364_vm6, %v980_v3, %v1492_v29  ;;  %vm1362_vm8 = vcmp.ge.f32.partialorder %v972_v9, 0.0  ;;  %v3810_v24 = vpop.f32.mrb[52].mxu0  ;;  %v3812_v40 = vpop.f32.mrb[52].mxu1 }
 0x18e   : > { %v1490_v30 = vmul.f32 0.2, %v972_v9  ;;  %2256 = vst.msk [vmem:[%s3385_s28 + $0x94] sm:$0xf] %vm2218_vm0, %v2666_v16  ;;  %v2671_v6 = vpack.c.bf16 %v1620_v21, %v1620_v21  ;;  %vm1426_vm9 = vcmp.ge.f32.partialorder %v1228_v15, 0.0  ;;  %v3816_v11 = vpop.f32.mrb[53].mxu0  ;;  %v983_v61 = vadd.f32 %v3748_v1, %v3694_v44 }
 0x18f   : > { %v1684_v25 = vsel %vm1428_vm7, %v1236_v5, %v1556_v18  ;;  %v1554_v41 = vmul.f32 0.2, %v1228_v15  ;;  %v3818_v32 = vpop.f32.mrb[53].mxu1  ;;  %2320 = vst.msk [vmem:[%s3385_s28 + $0x194] sm:$0xf] %vm2218_vm0, %v2730_v43  ;;  %v1239_v34 = vadd.f32 %v3748_v1, %v3696_v45  ;;  %v3826_v39 = vpop.f32.mrb[54].mxu0  ;;  %v975_v46 = vadd.f32 %v3748_v1, %v3700_v48 }
 0x190   : > { %v2735_v33 = vpack.c.bf16 %v1684_v25, %v1684_v25  ;;  %v1618_v58 = vsel %vm1362_vm8, %v972_v9, %v1490_v30  ;;  %v3828_v22 = vpop.f32.mrb[54].mxu1  ;;  %2261 = vst.msk [vmem:[%s3385_s28 + $0xa8] sm:$0xf] %vm2218_vm0, %v2671_v6  ;;  %v1231_v56 = vadd.f32 %v3748_v1, %v3710_v53  ;;  %v3836_v44 = vpop.f32.mrb[55].mxu0  ;;  %vm1365_vm10 = vcmp.ge.f32.partialorder %v983_v61, 0.0 }
 0x191   : > { %v2669_v42 = vpack.c.bf16 %v1618_v58, %v1618_v58  ;;  %v1682_v23 = vsel %vm1426_vm9, %v1228_v15, %v1554_v41  ;;  %v3838_v0 = vpop.f32.mrb[55].mxu1  ;;  %v1493_v47 = vmul.f32 0.2, %v983_v61  ;;  %vm1429_vm11 = vcmp.ge.f32.partialorder %v1239_v34, 0.0 }
 0x192   : > { %2325 = vst.msk [vmem:[%s3385_s28 + $0x1a8] sm:$0xf] %vm2218_vm0, %v2735_v33  ;;  %v2733_v45 = vpack.c.bf16 %v1682_v23, %v1682_v23  ;;  %v1557_v26 = vmul.f32 0.2, %v1239_v34  ;;  %vm1363_vm12 = vcmp.ge.f32.partialorder %v975_v46, 0.0  ;;  %vm1427_vm13 = vcmp.ge.f32.partialorder %v1231_v56, 0.0 }
 0x193   : > { %2259 = vst.msk [vmem:[%s3385_s28 + $0xa0] sm:$0xf] %vm2218_vm0, %v2669_v42  ;;  %v1491_v36 = vmul.f32 0.2, %v975_v46  ;;  %v1621_v48 = vsel %vm1365_vm10, %v983_v61, %v1493_v47  ;;  %v1555_v53 = vmul.f32 0.2, %v1231_v56  ;;  %v996_v37 = vadd.f32 %v3748_v1, %v3729_v63 }
 0x194   : > { %2323 = vst.msk [vmem:[%s3385_s28 + $0x1a0] sm:$0xf] %vm2218_vm0, %v2733_v45  ;;  %v1252_v54 = vadd.f32 %v3748_v1, %v3731_v13  ;;  %v2672_v55 = vpack.c.bf16 %v1621_v48, %v1621_v48  ;;  %v1685_v59 = vsel %vm1429_vm11, %v1239_v34, %v1557_v26  ;;  %v988_v31 = vadd.f32 %v3748_v1, %v3733_v19 }
 0x195   : > { %v1619_v60 = vsel %vm1363_vm12, %v975_v46, %v1491_v36  ;;  %v2736_v52 = vpack.c.bf16 %v1685_v59, %v1685_v59  ;;  %v1683_v35 = vsel %vm1427_vm13, %v1231_v56, %v1555_v53  ;;  %vm1368_vm14 = vcmp.ge.f32.partialorder %v996_v37, 0.0  ;;  %v3852_v3 = vpop.f32.mrb[56].mxu0  ;;  %v3854_v12 = vpop.f32.mrb[56].mxu1 }
 0x196   : > { %v2670_v10 = vpack.c.bf16 %v1619_v60, %v1619_v60  ;;  %2262 = vst.msk [vmem:[%s3385_s28 + $0xac] sm:$0xf] %vm2218_vm0, %v2672_v55  ;;  %v2734_v63 = vpack.c.bf16 %v1683_v35, %v1683_v35  ;;  %v1496_v13 = vmul.f32 0.2, %v996_v37  ;;  %vm1432_vm15 = vcmp.ge.f32.partialorder %v1252_v54, 0.0  ;;  %v3858_v9 = vpop.f32.mrb[57].mxu0 }
 0x197   : > { %v1560_v5 = vmul.f32 0.2, %v1252_v54  ;;  %2326 = vst.msk [vmem:[%s3385_s28 + $0x1ac] sm:$0xf] %vm2218_vm0, %v2736_v52  ;;  %vm1366_vm1 = vcmp.ge.f32.partialorder %v988_v31, 0.0  ;;  %v1244_v14 = vadd.f32 %v3748_v1, %v3735_v20  ;;  %v999_v29 = vadd.f32 %v3748_v1, %v3737_v8  ;;  %v3868_v15 = vpop.f32.mrb[57].mxu1 }
 0x198   : > { %2260 = vst.msk [vmem:[%s3385_s28 + $0xa4] sm:$0xf] %vm2218_vm0, %v2670_v10  ;;  %v1494_v19 = vmul.f32 0.2, %v988_v31  ;;  %v3870_v16 = vpop.f32.mrb[58].mxu0  ;;  %v1624_v17 = vsel %vm1368_vm14, %v996_v37, %v1496_v13  ;;  %v1255_v43 = vadd.f32 %v3748_v1, %v3739_v57  ;;  %v991_v20 = vadd.f32 %v3748_v1, %v3754_v28  ;;  %v3879_v21 = vpop.f32.mrb[58].mxu1 }
 0x199   : > { %2324 = vst.msk [vmem:[%s3385_s28 + $0x1a4] sm:$0xf] %vm2218_vm0, %v2734_v63  ;;  %v1688_v18 = vsel %vm1432_vm15, %v1252_v54, %v1560_v5  ;;  %v3881_v8 = vpop.f32.mrb[59].mxu0  ;;  %v2675_v30 = vpack.c.bf16 %v1624_v17, %v1624_v17  ;;  %vm1430_vm2 = vcmp.ge.f32.partialorder %v1244_v14, 0.0  ;;  %v3883_v41 = vpop.f32.mrb[59].mxu1  ;;  %vm1369_vm3 = vcmp.ge.f32.partialorder %v999_v29, 0.0 }
 0x19a   : > { %v2739_v6 = vpack.c.bf16 %v1688_v18, %v1688_v18  ;;  %v1622_v25 = vsel %vm1366_vm1, %v988_v31, %v1494_v19  ;;  %v1558_v58 = vmul.f32 0.2, %v1244_v14  ;;  %v1497_v61 = vmul.f32 0.2, %v999_v29 }
 0x19b   : > { %v2673_v33 = vpack.c.bf16 %v1622_v25, %v1622_v25  ;;  %2265 = vst.msk [vmem:[%s3385_s28 + $0xb8] sm:$0xf] %vm2218_vm0, %v2675_v30  ;;  %vm1433_vm4 = vcmp.ge.f32.partialorder %v1255_v43, 0.0  ;;  %v1561_v57 = vmul.f32 0.2, %v1255_v43  ;;  %vm1367_vm5 = vcmp.ge.f32.partialorder %v991_v20, 0.0 }
 0x19c   : > { %2329 = vst.msk [vmem:[%s3385_s28 + $0x1b8] sm:$0xf] %vm2218_vm0, %v2739_v6  ;;  %v1495_v28 = vmul.f32 0.2, %v991_v20  ;;  %v1686_v34 = vsel %vm1430_vm2, %v1244_v14, %v1558_v58  ;;  %v1625_v42 = vsel %vm1369_vm3, %v999_v29, %v1497_v61  ;;  %v1247_v23 = vadd.f32 %v3748_v1, %v3756_v7 }
 0x19d   : > { %2263 = vst.msk [vmem:[%s3385_s28 + $0xb0] sm:$0xf] %vm2218_vm0, %v2673_v33  ;;  %v1012_v46 = vadd.f32 %v3748_v1, %v3770_v4  ;;  %v2737_v56 = vpack.c.bf16 %v1686_v34, %v1686_v34  ;;  %v2676_v45 = vpack.c.bf16 %v1625_v42, %v1625_v42  ;;  %v1689_v47 = vsel %vm1433_vm4, %v1255_v43, %v1561_v57  ;;  %v3895_v36 = vpop.f32.mrb[60].mxu0  ;;  %v3897_v48 = vpop.f32.mrb[60].mxu1 }
 0x19e   : > { %v1623_v26 = vsel %vm1367_vm5, %v991_v20, %v1495_v28  ;;  %v2740_v53 = vpack.c.bf16 %v1689_v47, %v1689_v47  ;;  %vm1431_vm6 = vcmp.ge.f32.partialorder %v1247_v23, 0.0  ;;  %v1559_v54 = vmul.f32 0.2, %v1247_v23  ;;  %v3899_v55 = vpop.f32.mrb[61].mxu0  ;;  %v3901_v7 = vpop.f32.mrb[61].mxu1 }
 0x19f   : > { %v2674_v37 = vpack.c.bf16 %v1623_v26, %v1623_v26  ;;  %2327 = vst.msk [vmem:[%s3385_s28 + $0x1b0] sm:$0xf] %vm2218_vm0, %v2737_v56  ;;  %2266 = vst.msk [vmem:[%s3385_s28 + $0xbc] sm:$0xf] %vm2218_vm0, %v2676_v45  ;;  %vm1372_vm7 = vcmp.ge.f32.partialorder %v1012_v46, 0.0  ;;  %v1268_v59 = vadd.f32 %v3748_v1, %v3774_v49  ;;  %v1004_v60 = vadd.f32 %v3748_v1, %v3776_v50  ;;  %v3911_v31 = vpop.f32.mrb[62].mxu0 }
 0x1a0   : > { %v1500_v4 = vmul.f32 0.2, %v1012_v46  ;;  %v3913_v52 = vpop.f32.mrb[62].mxu1  ;;  %2330 = vst.msk [vmem:[%s3385_s28 + $0x1bc] sm:$0xf] %vm2218_vm0, %v2740_v53  ;;  %v1687_v10 = vsel %vm1431_vm6, %v1247_v23, %v1559_v54  ;;  %v1260_v35 = vadd.f32 %v3748_v1, %v3780_v51  ;;  %v1015_v63 = vadd.f32 %v3748_v1, %v3782_v27  ;;  %v3925_v50 = vpop.f32.mrb[63].mxu0 }
 0x1a1   : > { %2264 = vst.msk [vmem:[%s3385_s28 + $0xb4] sm:$0xf] %vm2218_vm0, %v2674_v37  ;;  %v1271_v49 = vadd.f32 %v3748_v1, %v3788_v62  ;;  %v3927_v13 = vpop.f32.mrb[63].mxu1  ;;  %v2738_v5 = vpack.c.bf16 %v1687_v10, %v1687_v10  ;;  %vm1436_vm8 = vcmp.ge.f32.partialorder %v1268_v59, 0.0  ;;  %v1564_v14 = vmul.f32 0.2, %v1268_v59 }
 0x1a2   : > { %v1628_v19 = vsel %vm1372_vm7, %v1012_v46, %v1500_v4  ;;  %vm1370_vm9 = vcmp.ge.f32.partialorder %v1004_v60, 0.0  ;;  %v1498_v17 = vmul.f32 0.2, %v1004_v60  ;;  %vm1434_vm10 = vcmp.ge.f32.partialorder %v1260_v35, 0.0 }
 0x1a3   : > { %v2679_v29 = vpack.c.bf16 %v1628_v19, %v1628_v19  ;;  %2328 = vst.msk [vmem:[%s3385_s28 + $0x1b4] sm:$0xf] %vm2218_vm0, %v2738_v5  ;;  %v1692_v51 = vsel %vm1436_vm8, %v1268_v59, %v1564_v14  ;;  %v1562_v27 = vmul.f32 0.2, %v1260_v35  ;;  %vm1373_vm11 = vcmp.ge.f32.partialorder %v1015_v63, 0.0 }
 0x1a4   : > { %v1501_v62 = vmul.f32 0.2, %v1015_v63  ;;  %v2743_v18 = vpack.c.bf16 %v1692_v51, %v1692_v51  ;;  %v1626_v43 = vsel %vm1370_vm9, %v1004_v60, %v1498_v17  ;;  %vm1437_vm12 = vcmp.ge.f32.partialorder %v1271_v49, 0.0 }
 0x1a5   : > { %2269 = vst.msk [vmem:[%s3385_s28 + $0xc8] sm:$0xf] %vm2218_vm0, %v2679_v29  ;;  %v1565_v20 = vmul.f32 0.2, %v1271_v49  ;;  %v2677_v30 = vpack.c.bf16 %v1626_v43, %v1626_v43  ;;  %v1690_v6 = vsel %vm1434_vm10, %v1260_v35, %v1562_v27  ;;  %v1007_v33 = vadd.f32 %v3748_v1, %v3790_v2 }
 0x1a6   : > { %v1629_v25 = vsel %vm1373_vm11, %v1015_v63, %v1501_v62  ;;  %2333 = vst.msk [vmem:[%s3385_s28 + $0x1c8] sm:$0xf] %vm2218_vm0, %v2743_v18  ;;  %v2741_v58 = vpack.c.bf16 %v1690_v6, %v1690_v6  ;;  %v1263_v28 = vadd.f32 %v3748_v1, %v3796_v38  ;;  %v1028_v23 = vadd.f32 %v3748_v1, %v3810_v24 }
 0x1a7   : > { %v2680_v61 = vpack.c.bf16 %v1629_v25, %v1629_v25  ;;  %v1693_v57 = vsel %vm1437_vm12, %v1271_v49, %v1565_v20  ;;  %2267 = vst.msk [vmem:[%s3385_s28 + $0xc0] sm:$0xf] %vm2218_vm0, %v2677_v30  ;;  %vm1371_vm13 = vcmp.ge.f32.partialorder %v1007_v33, 0.0  ;;  %v1499_v42 = vmul.f32 0.2, %v1007_v33 }
 0x1a8   : > { %v2744_v34 = vpack.c.bf16 %v1693_v57, %v1693_v57  ;;  %2331 = vst.msk [vmem:[%s3385_s28 + $0x1c0] sm:$0xf] %vm2218_vm0, %v2741_v58  ;;  %vm1435_vm14 = vcmp.ge.f32.partialorder %v1263_v28, 0.0  ;;  %v1563_v2 = vmul.f32 0.2, %v1263_v28  ;;  %v1284_v46 = vadd.f32 %v3748_v1, %v3812_v40 }
 0x1a9   : > { %2270 = vst.msk [vmem:[%s3385_s28 + $0xcc] sm:$0xf] %vm2218_vm0, %v2680_v61  ;;  %v1020_v38 = vadd.f32 %v3748_v1, %v3816_v11  ;;  %v1627_v56 = vsel %vm1371_vm13, %v1007_v33, %v1499_v42  ;;  %vm1376_vm15 = vcmp.ge.f32.partialorder %v1028_v23, 0.0  ;;  %v1504_v45 = vmul.f32 0.2, %v1028_v23 }
 0x1aa   : > { %2334 = vst.msk [vmem:[%s3385_s28 + $0x1cc] sm:$0xf] %vm2218_vm0, %v2744_v34  ;;  %v1276_v24 = vadd.f32 %v3748_v1, %v3818_v32  ;;  %v2678_v47 = vpack.c.bf16 %v1627_v56, %v1627_v56  ;;  %v1691_v26 = vsel %vm1435_vm14, %v1263_v28, %v1563_v2  ;;  %vm1440_vm1 = vcmp.ge.f32.partialorder %v1284_v46, 0.0 }
 0x1ab   : > { %v1568_v53 = vmul.f32 0.2, %v1284_v46  ;;  %v2742_v37 = vpack.c.bf16 %v1691_v26, %v1691_v26  ;;  %v1632_v54 = vsel %vm1376_vm15, %v1028_v23, %v1504_v45  ;;  %vm1374_vm2 = vcmp.ge.f32.partialorder %v1020_v38, 0.0 }
 0x1ac   : > { %v1502_v40 = vmul.f32 0.2, %v1020_v38  ;;  %2268 = vst.msk [vmem:[%s3385_s28 + $0xc4] sm:$0xf] %vm2218_vm0, %v2678_v47  ;;  %v2683_v11 = vpack.c.bf16 %v1632_v54, %v1632_v54  ;;  %vm1438_vm3 = vcmp.ge.f32.partialorder %v1276_v24, 0.0  ;;  %v1031_v10 = vadd.f32 %v3748_v1, %v3826_v39 }
 0x1ad   : > { %v1696_v4 = vsel %vm1440_vm1, %v1284_v46, %v1568_v53  ;;  %v1566_v59 = vmul.f32 0.2, %v1276_v24  ;;  %2332 = vst.msk [vmem:[%s3385_s28 + $0x1c4] sm:$0xf] %vm2218_vm0, %v2742_v37  ;;  %v1287_v35 = vadd.f32 %v3748_v1, %v3828_v22  ;;  %v1023_v5 = vadd.f32 %v3748_v1, %v3836_v44 }
 0x1ae   : > { %v2747_v32 = vpack.c.bf16 %v1696_v4, %v1696_v4  ;;  %v1630_v60 = vsel %vm1374_vm2, %v1020_v38, %v1502_v40  ;;  %2273 = vst.msk [vmem:[%s3385_s28 + $0xd8] sm:$0xf] %vm2218_vm0, %v2683_v11  ;;  %v1279_v19 = vadd.f32 %v3748_v1, %v3838_v0  ;;  %vm1377_vm4 = vcmp.ge.f32.partialorder %v1031_v10, 0.0 }
 0x1af   : > { %v2681_v63 = vpack.c.bf16 %v1630_v60, %v1630_v60  ;;  %v1694_v49 = vsel %vm1438_vm3, %v1276_v24, %v1566_v59  ;;  %v1505_v29 = vmul.f32 0.2, %v1031_v10  ;;  %vm1441_vm5 = vcmp.ge.f32.partialorder %v1287_v35, 0.0 }
 0x1b0   : > { %2337 = vst.msk [vmem:[%s3385_s28 + $0x1d8] sm:$0xf] %vm2218_vm0, %v2747_v32  ;;  %v2745_v14 = vpack.c.bf16 %v1694_v49, %v1694_v49  ;;  %v1569_v39 = vmul.f32 0.2, %v1287_v35  ;;  %vm1375_vm6 = vcmp.ge.f32.partialorder %v1023_v5, 0.0  ;;  %vm1439_vm7 = vcmp.ge.f32.partialorder %v1279_v19, 0.0 }
 0x1b1   : > { %2271 = vst.msk [vmem:[%s3385_s28 + $0xd0] sm:$0xf] %vm2218_vm0, %v2681_v63  ;;  %v1503_v22 = vmul.f32 0.2, %v1023_v5  ;;  %v1633_v17 = vsel %vm1377_vm4, %v1031_v10, %v1505_v29  ;;  %v1567_v44 = vmul.f32 0.2, %v1279_v19  ;;  %v1044_v0 = vadd.f32 %v3748_v1, %v3852_v3 }
 0x1b2   : > { %2335 = vst.msk [vmem:[%s3385_s28 + $0x1d0] sm:$0xf] %vm2218_vm0, %v2745_v14  ;;  %v1300_v51 = vadd.f32 %v3748_v1, %v3854_v12  ;;  %v2684_v27 = vpack.c.bf16 %v1633_v17, %v1633_v17  ;;  %v1697_v62 = vsel %vm1441_vm5, %v1287_v35, %v1569_v39  ;;  %v1036_v43 = vadd.f32 %v3748_v1, %v3858_v9 }
 0x1b3   : > { %v1631_v18 = vsel %vm1375_vm6, %v1023_v5, %v1503_v22  ;;  %v2748_v20 = vpack.c.bf16 %v1697_v62, %v1697_v62  ;;  %v1695_v6 = vsel %vm1439_vm7, %v1279_v19, %v1567_v44  ;;  %vm1380_vm8 = vcmp.ge.f32.partialorder %v1044_v0, 0.0 }
 0x1b4   : > { %v2682_v30 = vpack.c.bf16 %v1631_v18, %v1631_v18  ;;  %2274 = vst.msk [vmem:[%s3385_s28 + $0xdc] sm:$0xf] %vm2218_vm0, %v2684_v27  ;;  %v2746_v25 = vpack.c.bf16 %v1695_v6, %v1695_v6  ;;  %v1508_v33 = vmul.f32 0.2, %v1044_v0  ;;  %vm1444_vm9 = vcmp.ge.f32.partialorder %v1300_v51, 0.0 }
 0x1b5   : > { %v1572_v3 = vmul.f32 0.2, %v1300_v51  ;;  %2338 = vst.msk [vmem:[%s3385_s28 + $0x1dc] sm:$0xf] %vm2218_vm0, %v2748_v20  ;;  %vm1378_vm10 = vcmp.ge.f32.partialorder %v1036_v43, 0.0  ;;  %v1292_v9 = vadd.f32 %v3748_v1, %v3868_v15  ;;  %v1047_v58 = vadd.f32 %v3748_v1, %v3870_v16 }
 0x1b6   : > { %2272 = vst.msk [vmem:[%s3385_s28 + $0xd4] sm:$0xf] %vm2218_vm0, %v2682_v30  ;;  %v1506_v12 = vmul.f32 0.2, %v1036_v43  ;;  %2336 = vst.msk [vmem:[%s3385_s28 + $0x1d4] sm:$0xf] %vm2218_vm0, %v2746_v25  ;;  %v1636_v61 = vsel %vm1380_vm8, %v1044_v0, %v1508_v33  ;;  %v1303_v28 = vadd.f32 %v3748_v1, %v3879_v21  ;;  %v1039_v34 = vadd.f32 %v3748_v1, %v3881_v8 }
 0x1b7   : > { %v1700_v57 = vsel %vm1444_vm9, %v1300_v51, %v1572_v3  ;;  %v2687_v42 = vpack.c.bf16 %v1636_v61, %v1636_v61  ;;  %vm1442_vm11 = vcmp.ge.f32.partialorder %v1292_v9, 0.0  ;;  %v1570_v46 = vmul.f32 0.2, %v1292_v9 }
 0x1b8   : > { %v2751_v23 = vpack.c.bf16 %v1700_v57, %v1700_v57  ;;  %v1634_v2 = vsel %vm1378_vm10, %v1036_v43, %v1506_v12  ;;  %vm1381_vm12 = vcmp.ge.f32.partialorder %v1047_v58, 0.0  ;;  %v1509_v38 = vmul.f32 0.2, %v1047_v58 }
 0x1b9   : > { %v2685_v15 = vpack.c.bf16 %v1634_v2, %v1634_v2  ;;  %2277 = vst.msk [vmem:[%s3385_s28 + $0xe8] sm:$0xf] %vm2218_vm0, %v2687_v42  ;;  %vm1445_vm13 = vcmp.ge.f32.partialorder %v1303_v28, 0.0  ;;  %v1573_v16 = vmul.f32 0.2, %v1303_v28  ;;  %vm1379_vm14 = vcmp.ge.f32.partialorder %v1039_v34, 0.0 }
 0x1ba   : > { %2341 = vst.msk [vmem:[%s3385_s28 + $0x1e8] sm:$0xf] %vm2218_vm0, %v2751_v23  ;;  %v1507_v21 = vmul.f32 0.2, %v1039_v34  ;;  %v1698_v8 = vsel %vm1442_vm11, %v1292_v9, %v1570_v46  ;;  %v1637_v56 = vsel %vm1381_vm12, %v1047_v58, %v1509_v38  ;;  %v1295_v45 = vadd.f32 %v3748_v1, %v3883_v41 }
 0x1bb   : > { %2275 = vst.msk [vmem:[%s3385_s28 + $0xe0] sm:$0xf] %vm2218_vm0, %v2685_v15  ;;  %v1060_v24 = vadd.f32 %v3748_v1, %v3895_v36  ;;  %v2749_v47 = vpack.c.bf16 %v1698_v8, %v1698_v8  ;;  %v2688_v26 = vpack.c.bf16 %v1637_v56, %v1637_v56  ;;  %v1701_v53 = vsel %vm1445_vm13, %v1303_v28, %v1573_v16 }
 0x1bc   : > { %v1635_v37 = vsel %vm1379_vm14, %v1039_v34, %v1507_v21  ;;  %v2752_v54 = vpack.c.bf16 %v1701_v53, %v1701_v53  ;;  %vm1443_vm15 = vcmp.ge.f32.partialorder %v1295_v45, 0.0  ;;  %v1571_v11 = vmul.f32 0.2, %v1295_v45 }
 0x1bd   : > { %v2686_v40 = vpack.c.bf16 %v1635_v37, %v1635_v37  ;;  %2339 = vst.msk [vmem:[%s3385_s28 + $0x1e0] sm:$0xf] %vm2218_vm0, %v2749_v47  ;;  %2278 = vst.msk [vmem:[%s3385_s28 + $0xec] sm:$0xf] %vm2218_vm0, %v2688_v26  ;;  %vm1384_vm1 = vcmp.ge.f32.partialorder %v1060_v24, 0.0  ;;  %v1316_v41 = vadd.f32 %v3748_v1, %v3897_v48  ;;  %v1052_v36 = vadd.f32 %v3748_v1, %v3899_v55 }
 0x1be   : > { %v1512_v4 = vmul.f32 0.2, %v1060_v24  ;;  %2342 = vst.msk [vmem:[%s3385_s28 + $0x1ec] sm:$0xf] %vm2218_vm0, %v2752_v54  ;;  %v1699_v59 = vsel %vm1443_vm15, %v1295_v45, %v1571_v11  ;;  %v1308_v32 = vadd.f32 %v3748_v1, %v3901_v7  ;;  %v1063_v60 = vadd.f32 %v3748_v1, %v3911_v31 }
 0x1bf   : > { %2276 = vst.msk [vmem:[%s3385_s28 + $0xe4] sm:$0xf] %vm2218_vm0, %v2686_v40  ;;  %v1319_v10 = vadd.f32 %v3748_v1, %v3913_v52  ;;  %v2750_v48 = vpack.c.bf16 %v1699_v59, %v1699_v59  ;;  %vm1448_vm2 = vcmp.ge.f32.partialorder %v1316_v41, 0.0  ;;  %v1576_v63 = vmul.f32 0.2, %v1316_v41 }
 0x1c0   : > { %v1640_v35 = vsel %vm1384_vm1, %v1060_v24, %v1512_v4  ;;  %vm1382_vm3 = vcmp.ge.f32.partialorder %v1052_v36, 0.0  ;;  %v1510_v49 = vmul.f32 0.2, %v1052_v36  ;;  %vm1446_vm4 = vcmp.ge.f32.partialorder %v1308_v32, 0.0 }
 0x1c1   : > { %v2691_v55 = vpack.c.bf16 %v1640_v35, %v1640_v35  ;;  %2340 = vst.msk [vmem:[%s3385_s28 + $0x1e4] sm:$0xf] %vm2218_vm0, %v2750_v48  ;;  %v1704_v5 = vsel %vm1448_vm2, %v1316_v41, %v1576_v63  ;;  %v1574_v7 = vmul.f32 0.2, %v1308_v32  ;;  %vm1385_vm5 = vcmp.ge.f32.partialorder %v1063_v60, 0.0 }
 0x1c2   : > { %v1513_v19 = vmul.f32 0.2, %v1063_v60  ;;  %v2755_v31 = vpack.c.bf16 %v1704_v5, %v1704_v5  ;;  %v1638_v52 = vsel %vm1382_vm3, %v1052_v36, %v1510_v49  ;;  %vm1449_vm6 = vcmp.ge.f32.partialorder %v1319_v10, 0.0 }
 0x1c3   : > { %2281 = vst.msk [vmem:[%s3385_s28 + $0xf8] sm:$0xf] %vm2218_vm0, %v2691_v55  ;;  %v1577_v14 = vmul.f32 0.2, %v1319_v10  ;;  %v2689_v29 = vpack.c.bf16 %v1638_v52, %v1638_v52  ;;  %v1702_v39 = vsel %vm1446_vm4, %v1308_v32, %v1574_v7  ;;  %v1055_v17 = vadd.f32 %v3748_v1, %v3925_v50 }
 0x1c4   : > { %v1641_v22 = vsel %vm1385_vm5, %v1063_v60, %v1513_v19  ;;  %2345 = vst.msk [vmem:[%s3385_s28 + $0x1f8] sm:$0xf] %vm2218_vm0, %v2755_v31  ;;  %v2753_v44 = vpack.c.bf16 %v1702_v39, %v1702_v39  ;;  %v1311_v27 = vadd.f32 %v3748_v1, %v3927_v13 }
 0x1c5   : > { %v2692_v0 = vpack.c.bf16 %v1641_v22, %v1641_v22  ;;  %v1705_v51 = vsel %vm1449_vm6, %v1319_v10, %v1577_v14  ;;  %2279 = vst.msk [vmem:[%s3385_s28 + $0xf0] sm:$0xf] %vm2218_vm0, %v2689_v29  ;;  %vm1383_vm7 = vcmp.ge.f32.partialorder %v1055_v17, 0.0  ;;  %v1511_v18 = vmul.f32 0.2, %v1055_v17 }
 0x1c6   : > { %v2756_v62 = vpack.c.bf16 %v1705_v51, %v1705_v51  ;;  %2343 = vst.msk [vmem:[%s3385_s28 + $0x1f0] sm:$0xf] %vm2218_vm0, %v2753_v44  ;;  %vm1447_vm8 = vcmp.ge.f32.partialorder %v1311_v27, 0.0  ;;  %v1575_v50 = vmul.f32 0.2, %v1311_v27 }
 0x1c7   : > { %2282 = vst.msk [vmem:[%s3385_s28 + $0xfc] sm:$0xf] %vm2218_vm0, %v2692_v0  ;;  %v1639_v43 = vsel %vm1383_vm7, %v1055_v17, %v1511_v18 }
 0x1c8   : > { %2346 = vst.msk [vmem:[%s3385_s28 + $0x1fc] sm:$0xf] %vm2218_vm0, %v2756_v62  ;;  %v2690_v20 = vpack.c.bf16 %v1639_v43, %v1639_v43  ;;  %v1703_v30 = vsel %vm1447_vm8, %v1311_v27, %v1575_v50 }
 0x1c9   : > { %v2754_v6 = vpack.c.bf16 %v1703_v30, %v1703_v30 }
 0x1ca   : > { %2280 = vst.msk [vmem:[%s3385_s28 + $0xf4] sm:$0xf] %vm2218_vm0, %v2690_v20 }
 0x1cb   : > { %2344 = vst.msk [vmem:[%s3385_s28 + $0x1f4] sm:$0xf] %vm2218_vm0, %v2754_v6 }
 0x1cc PF: > { %p13_p8 = scmp.ge.s32.totalorder %s3212_s17, 4   ;;  %s4067_s12 = smov %s3159_s13 }
 0x1cd   : > { %s4068_s13 = smov %s3163_s14  ;;  %s4069_s14 = smov %s3222_s20 }
 0x1ce   : > { %s4070_s15 = smov %s3212_s17  ;;  %15 = sbr.rel (!%p13_p8) target bundleno = 3 (0x3), region = 72 }
 0x1d5   :  { %2369 = vsyncpa [#allocation3], 1 }
 0x1d6   :  { %2371 = vsyncpa [#allocation3 + $0x1], 1 }

</bundles_post_ra>
